<compile_context>
chip_gen: v6e
topology: v6e:2x2x1
jax: 0.10.0
libtpu: 0.0.40
codegen_flags: <defaults>
</compile_context>

<pallas_src>
import functools
import math

import jax
import jax.numpy as jnp
from jax.experimental import pallas as pl
from jax.experimental.pallas import tpu as pltpu


# ---------------------------------------------------------------- utilities
def _layer_norm(x, eps=1e-5):
    # fresh nn.LayerNorm(d_model): weight = 1, bias = 0, eps = 1e-5, biased var
    mean = jnp.mean(x, axis=-1, keepdims=True)
    var = jnp.mean(jnp.square(x - mean), axis=-1, keepdims=True)
    return (x - mean) * jax.lax.rsqrt(var + eps)


def _rows_to_lanes(x):
    """(R, C) -> (1, R*C) row-major, via lane concatenation (lane-dense store)."""
    r = x.shape[0]
    return jnp.concatenate([x[i:i + 1, :] for i in range(r)], axis=1)


def _attn_core(q_flat, kv_flat, resid, bias, w_o, *, n_heads, d_k, d_v, dt):
    """Multi-head attention core for one batch element.

    q_flat : (S_q, H*d_k)   -- already projected (scale folded into W_Q)
    kv_flat: (S_k, H*d_k + H*d_v)  -- [K | V] projected
    resid  : (S_q, d_model) residual input
    bias   : (S_q, S_k) additive mask bias (0 or -1e9)
    w_o    : (H*d_v, d_model)
    returns (out (S_q, d_model), probs_wide (S_q, H*S_k))
    """
    H = n_heads
    k_flat = kv_flat[:, :H * d_k]
    v_flat = kv_flat[:, H * d_k:]

    # Split heads with static lane slices, stack on a leading (batch) dim.
    qh = jnp.stack([q_flat[:, h * d_k:(h + 1) * d_k] for h in range(H)], axis=0)
    kh = jnp.stack([k_flat[:, h * d_k:(h + 1) * d_k] for h in range(H)], axis=0)
    vh = jnp.stack([v_flat[:, h * d_v:(h + 1) * d_v] for h in range(H)], axis=0)

    # scores = (Q/sqrt(d_k)) @ K^T + additive mask bias
    scores = jnp.einsum("hqd,hkd->hqk", qh.astype(dt), kh.astype(dt),
                        preferred_element_type=jnp.float32)     # (H, S_q, S_k)
    scores = scores + bias[None, :, :]

    # softmax in f32; denom reciprocal on the EUP
    m = jnp.max(scores, axis=-1, keepdims=True)
    e = jnp.exp(scores - m)
    denom = jnp.sum(e, axis=-1, keepdims=True)
    probs = e * pl.reciprocal(denom, approx=True)               # (H, S_q, S_k)

    ctx = jnp.einsum("hqk,hkd->hqd", probs.astype(dt), vh.astype(dt),
                     preferred_element_type=jnp.float32)        # (H, S_q, d_v)

    # Merge heads along lanes and do ONE output projection with the original W_O.
    ctx_wide = jnp.concatenate([ctx[h] for h in range(H)], axis=-1)   # (S_q, H*d_v)
    out = jnp.dot(ctx_wide.astype(dt), w_o,
                  preferred_element_type=jnp.float32)           # (S_q, d_model)
    out = _layer_norm(out + resid)

    probs_wide = jnp.concatenate([probs[h] for h in range(H)], axis=-1)  # (S_q, H*S_k)
    return out, probs_wide


# ---------------------------------------------------------------- fused kernel
def decoder_layer_kernel(dec_ref, enc_ref, sbias_ref, ebias_ref,
                         w_sqkv_ref, w_swo_ref,
                         w_eq_ref, w_ekv_ref, w_ewo_ref,
                         w1_ref, w2_ref,
                         out_ref, sattn_ref, eattn_ref,
                         *, n_heads, d_k, d_v, dt):
    H = n_heads
    dec_in = dec_ref[0]                                   # (S_dec, d_model)
    enc_out = enc_ref[0]                                  # (S_enc, d_model)

    # 1) masked self-attention + Add&Norm (single fused QKV matmul)
    s_qkv = jnp.dot(dec_in.astype(dt), w_sqkv_ref[...],
                    preferred_element_type=jnp.float32)   # (S_dec, H*(2dk+dv))
    x, sprobs = _attn_core(s_qkv[:, :H * d_k], s_qkv[:, H * d_k:],
                           dec_in, sbias_ref[0], w_swo_ref[...],
                           n_heads=H, d_k=d_k, d_v=d_v, dt=dt)
    sattn_ref[0] = _rows_to_lanes(sprobs).astype(sattn_ref.dtype)   # lane-dense store

    # 2) encoder-decoder cross attention + Add&Norm (fused [K|V] matmul)
    e_q = jnp.dot(x.astype(dt), w_eq_ref[...], preferred_element_type=jnp.float32)
    e_kv = jnp.dot(enc_out.astype(dt), w_ekv_ref[...], preferred_element_type=jnp.float32)
    x, eprobs = _attn_core(e_q, e_kv, x, ebias_ref[0], w_ewo_ref[...],
                           n_heads=H, d_k=d_k, d_v=d_v, dt=dt)
    eattn_ref[0] = _rows_to_lanes(eprobs).astype(eattn_ref.dtype)

    # 3) position-wise FFN + Add&Norm
    h = jnp.maximum(jnp.dot(x.astype(dt), w1_ref[...],
                            preferred_element_type=jnp.float32), 0.0)
    y = jnp.dot(h.astype(dt), w2_ref[...], preferred_element_type=jnp.float32)
    y = _layer_norm(y + x)
    out_ref[0] = _rows_to_lanes(y).astype(out_ref.dtype)


# ---------------------------------------------------------------- wrapper
def _full_spec(shape):
    nd = len(shape)
    return pl.BlockSpec(shape, lambda b: (0,) * nd)


def decoder_layer(dec_inputs, enc_outputs, dec_self_attn_mask, dec_enc_attn_mask,
                  params, *, n_heads, d_k, d_v, matmul_dtype=jnp.float32):
    B, S_dec, d_model = dec_inputs.shape
    S_enc = enc_outputs.shape[1]
    p = params
    scale = 1.0 / math.sqrt(d_k)
    dt = matmul_dtype

    # Weight prep (once, outside the kernel): fold 1/sqrt(d_k) into W_Q and fuse
    # the projection matrices so each projection is a single lane-dense matmul.
    w_sqkv = jnp.concatenate(
        [p["self_wq"] * scale, p["self_wk"], p["self_wv"]], axis=1).astype(dt)
    w_swo = p["self_wo"].astype(dt)                       # (H*d_v, d_model) as-is
    w_eq = (p["enc_wq"] * scale).astype(dt)
    w_ekv = jnp.concatenate([p["enc_wk"], p["enc_wv"]], axis=1).astype(dt)
    w_ewo = p["enc_wo"].astype(dt)
    w1 = p["ffn_w1"].astype(dt)
    w2 = p["ffn_w2"].astype(dt)

    # Additive mask bias: 0 where allowed, -1e9 where masked (replaces cmp+select).
    sbias = dec_self_attn_mask.astype(jnp.float32) * jnp.float32(-1e9)
    ebias = dec_enc_attn_mask.astype(jnp.float32) * jnp.float32(-1e9)

    kernel = functools.partial(decoder_layer_kernel,
                               n_heads=n_heads, d_k=d_k, d_v=d_v, dt=dt)

    out_flat, sattn_flat, eattn_flat = pl.pallas_call(
        kernel,
        out_shape=(
            jax.ShapeDtypeStruct((B, 1, S_dec * d_model), jnp.float32),
            jax.ShapeDtypeStruct((B, 1, S_dec * n_heads * S_dec), jnp.float32),
            jax.ShapeDtypeStruct((B, 1, S_dec * n_heads * S_enc), jnp.float32),
        ),
        grid=(B,),
        in_specs=[
            pl.BlockSpec((1, S_dec, d_model), lambda b: (b, 0, 0)),   # dec_inputs
            pl.BlockSpec((1, S_enc, d_model), lambda b: (b, 0, 0)),   # enc_outputs
            pl.BlockSpec((1, S_dec, S_dec), lambda b: (b, 0, 0)),     # self bias
            pl.BlockSpec((1, S_dec, S_enc), lambda b: (b, 0, 0)),     # cross bias
            _full_spec(w_sqkv.shape), _full_spec(w_swo.shape),
            _full_spec(w_eq.shape), _full_spec(w_ekv.shape), _full_spec(w_ewo.shape),
            _full_spec(w1.shape), _full_spec(w2.shape),
        ],
        out_specs=(
            pl.BlockSpec((1, 1, S_dec * d_model), lambda b: (b, 0, 0)),
            pl.BlockSpec((1, 1, S_dec * n_heads * S_dec), lambda b: (b, 0, 0)),
            pl.BlockSpec((1, 1, S_dec * n_heads * S_enc), lambda b: (b, 0, 0)),
        ),
        compiler_params=pltpu.CompilerParams(
            dimension_semantics=("parallel",),
            vmem_limit_bytes=32 * 1024 * 1024,
        ),
    )(dec_inputs, enc_outputs, sbias, ebias,
      w_sqkv, w_swo, w_eq, w_ekv, w_ewo, w1, w2)

    # Wrapper-side layout restore (pure plumbing, outside the kernel).
    out = out_flat.reshape(B, S_dec, d_model)
    self_attn = sattn_flat.reshape(B, S_dec, n_heads, S_dec).transpose(0, 2, 1, 3)
    enc_attn = eattn_flat.reshape(B, S_dec, n_heads, S_enc).transpose(0, 2, 1, 3)
    return out, self_attn, enc_attn


# ---------------------------------------------------------------- pure-JAX reference
def _ref_mha(q, k, v, mask, wq, wk, wv, wo, n_heads, d_k, d_v):
    B, Sq, d_model = q.shape
    Sk = k.shape[1]
    Q = (q @ wq).reshape(B, Sq, n_heads, d_k).transpose(0, 2, 1, 3)
    K = (k @ wk).reshape(B, Sk, n_heads, d_k).transpose(0, 2, 1, 3)
    V = (v @ wv).reshape(B, Sk, n_heads, d_v).transpose(0, 2, 1, 3)
    scores = jnp.einsum("bhqd,bhkd->bhqk", Q, K) / math.sqrt(d_k)
    scores = jnp.where(mask[:, None, :, :] > 0, jnp.float32(-1e9), scores)
    probs = jax.nn.softmax(scores, axis=-1)
    ctx = jnp.einsum("bhqk,bhkd->bhqd", probs, V)
    ctx = ctx.transpose(0, 2, 1, 3).reshape(B, Sq, n_heads * d_v)
    out = ctx @ wo
    return _layer_norm(out + q), probs


def _ref_decoder_layer(dec_inputs, enc_outputs, m1, m2, p, n_heads, d_k, d_v):
    o, a1 = _ref_mha(dec_inputs, dec_inputs, dec_inputs, m1,
                     p["self_wq"], p["self_wk"], p["self_wv"], p["self_wo"],
                     n_heads, d_k, d_v)
    o, a2 = _ref_mha(o, enc_outputs, enc_outputs, m2,
                     p["enc_wq"], p["enc_wk"], p["enc_wv"], p["enc_wo"],
                     n_heads, d_k, d_v)
    h = jnp.maximum(o @ p["ffn_w1"], 0.0) @ p["ffn_w2"]
    return _layer_norm(h + o), a1, a2


# ---------------------------------------------------------------- main
if __name__ == "__main__":
    B, S_dec, S_enc = 2, 8, 8
    d_model, d_ff, n_heads, d_k, d_v = 32, 64, 4, 8, 8

    key = jax.random.PRNGKey(0)
    keys = jax.random.split(key, 12)

    def linear_w(k, fan_in, fan_out):
        bound = 1.0 / math.sqrt(fan_in)          # ~ nn.Linear default init range
        return jax.random.uniform(k, (fan_in, fan_out), jnp.float32, -bound, bound)

    params = {
        "self_wq": linear_w(keys[0], d_model, n_heads * d_k),
        "self_wk": linear_w(keys[1], d_model, n_heads * d_k),
        "self_wv": linear_w(keys[2], d_model, n_heads * d_v),
        "self_wo": linear_w(keys[3], n_heads * d_v, d_model),
        "enc_wq":  linear_w(keys[4], d_model, n_heads * d_k),
        "enc_wk":  linear_w(keys[5], d_model, n_heads * d_k),
        "enc_wv":  linear_w(keys[6], d_model, n_heads * d_v),
        "enc_wo":  linear_w(keys[7], n_heads * d_v, d_model),
        "ffn_w1":  linear_w(keys[8], d_model, d_ff),
        "ffn_w2":  linear_w(keys[9], d_ff, d_model),
    }

    dec_inputs = jax.random.normal(keys[10], (B, S_dec, d_model), jnp.float32)
    enc_outputs = jax.random.normal(keys[11], (B, S_enc, d_model), jnp.float32)

    # causal (subsequent) mask for decoder self-attention: 1.0 above diagonal = masked
    causal = jnp.triu(jnp.ones((S_dec, S_dec), jnp.float32), k=1)
    dec_self_attn_mask = jnp.broadcast_to(causal, (B, S_dec, S_dec))
    # no padding in this synthetic example -> cross-attention mask all zeros
    dec_enc_attn_mask = jnp.zeros((B, S_dec, S_enc), jnp.float32)

    # matmul_dtype=jnp.bfloat16 is the recommended setting on v6e/v7x (re-check
    # tolerances ~2e-2); f32 here keeps exact module semantics for the assert.
    out, self_attn, enc_attn = decoder_layer(
        dec_inputs, enc_outputs, dec_self_attn_mask, dec_enc_attn_mask,
        params, n_heads=n_heads, d_k=d_k, d_v=d_v, matmul_dtype=jnp.float32)
    jax.block_until_ready((out, self_attn, enc_attn))

    # correctness check against pure-JAX reference (small slack for EUP approx recip)
    r_out, r_sa, r_ea = _ref_decoder_layer(
        dec_inputs, enc_outputs, dec_self_attn_mask, dec_enc_attn_mask,
        params, n_heads, d_k, d_v)
    assert out.shape == (B, S_dec, d_model)
    assert self_attn.shape == (B, n_heads, S_dec, S_dec)
    assert enc_attn.shape == (B, n_heads, S_dec, S_enc)
    assert jnp.allclose(out, r_out, atol=2e-3, rtol=2e-3)
    assert jnp.allclose(self_attn, r_sa, atol=2e-3, rtol=2e-3)
    assert jnp.allclose(enc_attn, r_ea, atol=2e-3, rtol=2e-3)

    print("KERNEL_OK")
</pallas_src>

<mosaic_0001>
module attributes {stable_mosaic.version = 11 : i64} {
  func.func @decoder_layer_kernel(%arg0: i32, %arg1: memref<1x8x32xf32, #tpu.memory_space<vmem>>, %arg2: memref<1x8x32xf32, #tpu.memory_space<vmem>>, %arg3: memref<1x8x8xf32, #tpu.memory_space<vmem>>, %arg4: memref<1x8x8xf32, #tpu.memory_space<vmem>>, %arg5: memref<32x96xf32, #tpu.memory_space<vmem>>, %arg6: memref<32x32xf32, #tpu.memory_space<vmem>>, %arg7: memref<32x32xf32, #tpu.memory_space<vmem>>, %arg8: memref<32x64xf32, #tpu.memory_space<vmem>>, %arg9: memref<32x32xf32, #tpu.memory_space<vmem>>, %arg10: memref<32x64xf32, #tpu.memory_space<vmem>>, %arg11: memref<64x32xf32, #tpu.memory_space<vmem>>, %arg12: memref<1x1x256xf32, #tpu.memory_space<vmem>>, %arg13: memref<1x1x256xf32, #tpu.memory_space<vmem>>, %arg14: memref<1x1x256xf32, #tpu.memory_space<vmem>>) attributes {dimension_semantics = [#tpu.dimension_semantics<parallel>], iteration_bounds = array<i64: 2>, scalar_prefetch = 0 : i64, scratch_operands = 0 : i64, tpu.core_type = #tpu.core_type<tc>, window_params = [{transform_indices = @transform_0, window_bounds = array<i64: 1, 8, 32>}, {transform_indices = @transform_1, window_bounds = array<i64: 1, 8, 32>}, {transform_indices = @transform_2, window_bounds = array<i64: 1, 8, 8>}, {transform_indices = @transform_3, window_bounds = array<i64: 1, 8, 8>}, {pipeline_mode = #tpu.pipeline_mode<synchronous>, transform_indices = @transform_4, window_bounds = array<i64: 32, 96>}, {pipeline_mode = #tpu.pipeline_mode<synchronous>, transform_indices = @transform_5, window_bounds = array<i64: 32, 32>}, {pipeline_mode = #tpu.pipeline_mode<synchronous>, transform_indices = @transform_6, window_bounds = array<i64: 32, 32>}, {pipeline_mode = #tpu.pipeline_mode<synchronous>, transform_indices = @transform_7, window_bounds = array<i64: 32, 64>}, {pipeline_mode = #tpu.pipeline_mode<synchronous>, transform_indices = @transform_8, window_bounds = array<i64: 32, 32>}, {pipeline_mode = #tpu.pipeline_mode<synchronous>, transform_indices = @transform_9, window_bounds = array<i64: 32, 64>}, {pipeline_mode = #tpu.pipeline_mode<synchronous>, transform_indices = @transform_10, window_bounds = array<i64: 64, 32>}, {transform_indices = @transform_11, window_bounds = array<i64: 1, 1, 256>}, {transform_indices = @transform_12, window_bounds = array<i64: 1, 1, 256>}, {transform_indices = @transform_13, window_bounds = array<i64: 1, 1, 256>}]} {
    %c0 = arith.constant 0 : index
    %c0_0 = arith.constant 0 : index
    %c0_1 = arith.constant 0 : index
    %0 = vector.load %arg1[%c0, %c0_0, %c0_1] : memref<1x8x32xf32, #tpu.memory_space<vmem>>, vector<1x8x32xf32>
    %1 = vector.shape_cast %0 : vector<1x8x32xf32> to vector<8x32xf32>
    %c0_2 = arith.constant 0 : index
    %c0_3 = arith.constant 0 : index
    %c0_4 = arith.constant 0 : index
    %2 = vector.load %arg2[%c0_2, %c0_3, %c0_4] : memref<1x8x32xf32, #tpu.memory_space<vmem>>, vector<1x8x32xf32>
    %3 = vector.shape_cast %2 : vector<1x8x32xf32> to vector<8x32xf32>
    %c0_5 = arith.constant 0 : index
    %c0_6 = arith.constant 0 : index
    %4 = vector.load %arg5[%c0_5, %c0_6] : memref<32x96xf32, #tpu.memory_space<vmem>>, vector<32x96xf32>
    %cst = arith.constant dense<0.000000e+00> : vector<8x96xf32>
    %5 = tpu.matmul %1, %4, %cst {dimension_numbers = #tpu.dot_dimension_numbers<[1], [0], [0], [1], [0, 0, 1, 1], [], []>} : vector<8x32xf32>, vector<32x96xf32>, vector<8x96xf32> -> vector<8x96xf32>
    %6 = vector.extract_strided_slice %5 {offsets = [0, 0], sizes = [8, 32], strides = [1, 1]} : vector<8x96xf32> to vector<8x32xf32>
    %7 = vector.extract_strided_slice %5 {offsets = [0, 32], sizes = [8, 64], strides = [1, 1]} : vector<8x96xf32> to vector<8x64xf32>
    %c0_7 = arith.constant 0 : index
    %c0_8 = arith.constant 0 : index
    %c0_9 = arith.constant 0 : index
    %8 = vector.load %arg3[%c0_7, %c0_8, %c0_9] : memref<1x8x8xf32, #tpu.memory_space<vmem>>, vector<1x8x8xf32>
    %9 = vector.shape_cast %8 : vector<1x8x8xf32> to vector<8x8xf32>
    %c0_10 = arith.constant 0 : index
    %c0_11 = arith.constant 0 : index
    %10 = vector.load %arg6[%c0_10, %c0_11] : memref<32x32xf32, #tpu.memory_space<vmem>>, vector<32x32xf32>
    %11 = vector.extract_strided_slice %7 {offsets = [0, 0], sizes = [8, 32], strides = [1, 1]} : vector<8x64xf32> to vector<8x32xf32>
    %12 = vector.extract_strided_slice %7 {offsets = [0, 32], sizes = [8, 32], strides = [1, 1]} : vector<8x64xf32> to vector<8x32xf32>
    %13 = vector.extract_strided_slice %6 {offsets = [0, 0], sizes = [8, 8], strides = [1, 1]} : vector<8x32xf32> to vector<8x8xf32>
    %14 = vector.extract_strided_slice %6 {offsets = [0, 8], sizes = [8, 8], strides = [1, 1]} : vector<8x32xf32> to vector<8x8xf32>
    %15 = vector.extract_strided_slice %6 {offsets = [0, 16], sizes = [8, 8], strides = [1, 1]} : vector<8x32xf32> to vector<8x8xf32>
    %16 = vector.extract_strided_slice %6 {offsets = [0, 24], sizes = [8, 8], strides = [1, 1]} : vector<8x32xf32> to vector<8x8xf32>
    %17 = vector.shape_cast %13 : vector<8x8xf32> to vector<1x8x8xf32>
    %18 = vector.shape_cast %14 : vector<8x8xf32> to vector<1x8x8xf32>
    %19 = vector.shape_cast %15 : vector<8x8xf32> to vector<1x8x8xf32>
    %20 = vector.shape_cast %16 : vector<8x8xf32> to vector<1x8x8xf32>
    %21 = tpu.concatenate %17, %18, %19, %20 in 0 : vector<1x8x8xf32>, vector<1x8x8xf32>, vector<1x8x8xf32>, vector<1x8x8xf32> -> vector<4x8x8xf32>
    %22 = vector.extract_strided_slice %11 {offsets = [0, 0], sizes = [8, 8], strides = [1, 1]} : vector<8x32xf32> to vector<8x8xf32>
    %23 = vector.extract_strided_slice %11 {offsets = [0, 8], sizes = [8, 8], strides = [1, 1]} : vector<8x32xf32> to vector<8x8xf32>
    %24 = vector.extract_strided_slice %11 {offsets = [0, 16], sizes = [8, 8], strides = [1, 1]} : vector<8x32xf32> to vector<8x8xf32>
    %25 = vector.extract_strided_slice %11 {offsets = [0, 24], sizes = [8, 8], strides = [1, 1]} : vector<8x32xf32> to vector<8x8xf32>
    %26 = vector.shape_cast %22 : vector<8x8xf32> to vector<1x8x8xf32>
    %27 = vector.shape_cast %23 : vector<8x8xf32> to vector<1x8x8xf32>
    %28 = vector.shape_cast %24 : vector<8x8xf32> to vector<1x8x8xf32>
    %29 = vector.shape_cast %25 : vector<8x8xf32> to vector<1x8x8xf32>
    %30 = tpu.concatenate %26, %27, %28, %29 in 0 : vector<1x8x8xf32>, vector<1x8x8xf32>, vector<1x8x8xf32>, vector<1x8x8xf32> -> vector<4x8x8xf32>
    %31 = vector.extract_strided_slice %12 {offsets = [0, 0], sizes = [8, 8], strides = [1, 1]} : vector<8x32xf32> to vector<8x8xf32>
    %32 = vector.extract_strided_slice %12 {offsets = [0, 8], sizes = [8, 8], strides = [1, 1]} : vector<8x32xf32> to vector<8x8xf32>
    %33 = vector.extract_strided_slice %12 {offsets = [0, 16], sizes = [8, 8], strides = [1, 1]} : vector<8x32xf32> to vector<8x8xf32>
    %34 = vector.extract_strided_slice %12 {offsets = [0, 24], sizes = [8, 8], strides = [1, 1]} : vector<8x32xf32> to vector<8x8xf32>
    %35 = vector.shape_cast %31 : vector<8x8xf32> to vector<1x8x8xf32>
    %36 = vector.shape_cast %32 : vector<8x8xf32> to vector<1x8x8xf32>
    %37 = vector.shape_cast %33 : vector<8x8xf32> to vector<1x8x8xf32>
    %38 = vector.shape_cast %34 : vector<8x8xf32> to vector<1x8x8xf32>
    %39 = tpu.concatenate %35, %36, %37, %38 in 0 : vector<1x8x8xf32>, vector<1x8x8xf32>, vector<1x8x8xf32>, vector<1x8x8xf32> -> vector<4x8x8xf32>
    "tpu.trace_start"() <{level = 10 : i32, message = "hqd,hkd->hqk"}> : () -> ()
    %cst_12 = arith.constant dense<0.000000e+00> : vector<4x8x8xf32>
    %40 = tpu.matmul %21, %30, %cst_12 {dimension_numbers = #tpu.dot_dimension_numbers<[2], [2], [1], [1], [0, 0, 0, 1, 1, 1], [0], [0]>} : vector<4x8x8xf32>, vector<4x8x8xf32>, vector<4x8x8xf32> -> vector<4x8x8xf32>
    "tpu.trace_stop"() : () -> ()
    %41 = vector.shape_cast %9 : vector<8x8xf32> to vector<1x8x8xf32>
    %42 = vector.broadcast %41 : vector<1x8x8xf32> to vector<4x8x8xf32>
    %43 = arith.addf %40, %42 : vector<4x8x8xf32>
    %cst_13 = arith.constant dense<0xFF800000> : vector<4x8xf32>
    %44 = vector.multi_reduction <maximumf>, %43, %cst_13 [2] : vector<4x8x8xf32> to vector<4x8xf32>
    %45 = vector.shape_cast %44 : vector<4x8xf32> to vector<4x8x1xf32>
    %46 = vector.broadcast %45 : vector<4x8x1xf32> to vector<4x8x8xf32>
    %47 = arith.subf %43, %46 : vector<4x8x8xf32>
    %48 = math.exp %47 : vector<4x8x8xf32>
    %cst_14 = arith.constant dense<0.000000e+00> : vector<4x8xf32>
    %49 = vector.multi_reduction <add>, %48, %cst_14 [2] : vector<4x8x8xf32> to vector<4x8xf32>
    %50 = vector.shape_cast %49 : vector<4x8xf32> to vector<4x8x1xf32>
    %51 = tpu.reciprocal %50 {approx = true} : vector<4x8x1xf32> -> vector<4x8x1xf32>
    %52 = vector.broadcast %51 : vector<4x8x1xf32> to vector<4x8x8xf32>
    %53 = arith.mulf %48, %52 : vector<4x8x8xf32>
    "tpu.trace_start"() <{level = 10 : i32, message = "hqk,hkd->hqd"}> : () -> ()
    %cst_15 = arith.constant dense<0.000000e+00> : vector<4x8x8xf32>
    %54 = tpu.matmul %53, %39, %cst_15 {dimension_numbers = #tpu.dot_dimension_numbers<[2], [1], [1], [2], [0, 0, 0, 1, 1, 2], [0], [0]>} : vector<4x8x8xf32>, vector<4x8x8xf32>, vector<4x8x8xf32> -> vector<4x8x8xf32>
    "tpu.trace_stop"() : () -> ()
    %55 = vector.extract_strided_slice %54 {offsets = [0, 0, 0], sizes = [1, 8, 8], strides = [1, 1, 1]} : vector<4x8x8xf32> to vector<1x8x8xf32>
    %56 = vector.shape_cast %55 : vector<1x8x8xf32> to vector<8x8xf32>
    %57 = vector.extract_strided_slice %54 {offsets = [1, 0, 0], sizes = [1, 8, 8], strides = [1, 1, 1]} : vector<4x8x8xf32> to vector<1x8x8xf32>
    %58 = vector.shape_cast %57 : vector<1x8x8xf32> to vector<8x8xf32>
    %59 = vector.extract_strided_slice %54 {offsets = [2, 0, 0], sizes = [1, 8, 8], strides = [1, 1, 1]} : vector<4x8x8xf32> to vector<1x8x8xf32>
    %60 = vector.shape_cast %59 : vector<1x8x8xf32> to vector<8x8xf32>
    %61 = vector.extract_strided_slice %54 {offsets = [3, 0, 0], sizes = [1, 8, 8], strides = [1, 1, 1]} : vector<4x8x8xf32> to vector<1x8x8xf32>
    %62 = vector.shape_cast %61 : vector<1x8x8xf32> to vector<8x8xf32>
    %63 = tpu.concatenate %56, %58, %60, %62 in 1 : vector<8x8xf32>, vector<8x8xf32>, vector<8x8xf32>, vector<8x8xf32> -> vector<8x32xf32>
    %cst_16 = arith.constant dense<0.000000e+00> : vector<8x32xf32>
    %64 = tpu.matmul %63, %10, %cst_16 {dimension_numbers = #tpu.dot_dimension_numbers<[1], [0], [0], [1], [0, 0, 1, 1], [], []>} : vector<8x32xf32>, vector<32x32xf32>, vector<8x32xf32> -> vector<8x32xf32>
    %65 = arith.addf %64, %1 : vector<8x32xf32>
    %cst_17 = arith.constant dense<0.000000e+00> : vector<8xf32>
    %66 = vector.multi_reduction <add>, %65, %cst_17 [1] : vector<8x32xf32> to vector<8xf32>
    %67 = vector.shape_cast %66 : vector<8xf32> to vector<8x1xf32>
    %cst_18 = arith.constant 3.200000e+01 : f32
    %68 = vector.broadcast %cst_18 : f32 to vector<8x1xf32>
    %69 = arith.divf %67, %68 : vector<8x1xf32>
    %70 = vector.broadcast %69 : vector<8x1xf32> to vector<8x32xf32>
    %71 = arith.subf %65, %70 : vector<8x32xf32>
    %72 = arith.mulf %71, %71 : vector<8x32xf32>
    %cst_19 = arith.constant dense<0.000000e+00> : vector<8xf32>
    %73 = vector.multi_reduction <add>, %72, %cst_19 [1] : vector<8x32xf32> to vector<8xf32>
    %74 = vector.shape_cast %73 : vector<8xf32> to vector<8x1xf32>
    %cst_20 = arith.constant 3.200000e+01 : f32
    %75 = vector.broadcast %cst_20 : f32 to vector<8x1xf32>
    %76 = arith.divf %74, %75 : vector<8x1xf32>
    %77 = vector.broadcast %69 : vector<8x1xf32> to vector<8x32xf32>
    %78 = arith.subf %65, %77 : vector<8x32xf32>
    %cst_21 = arith.constant 9.99999974E-6 : f32
    %79 = vector.broadcast %cst_21 : f32 to vector<8x1xf32>
    %80 = arith.addf %76, %79 : vector<8x1xf32>
    %81 = math.rsqrt %80 : vector<8x1xf32>
    %82 = vector.broadcast %81 : vector<8x1xf32> to vector<8x32xf32>
    %83 = arith.mulf %78, %82 : vector<8x32xf32>
    %84 = vector.extract_strided_slice %53 {offsets = [0, 0, 0], sizes = [1, 8, 8], strides = [1, 1, 1]} : vector<4x8x8xf32> to vector<1x8x8xf32>
    %85 = vector.shape_cast %84 : vector<1x8x8xf32> to vector<8x8xf32>
    %86 = vector.extract_strided_slice %53 {offsets = [1, 0, 0], sizes = [1, 8, 8], strides = [1, 1, 1]} : vector<4x8x8xf32> to vector<1x8x8xf32>
    %87 = vector.shape_cast %86 : vector<1x8x8xf32> to vector<8x8xf32>
    %88 = vector.extract_strided_slice %53 {offsets = [2, 0, 0], sizes = [1, 8, 8], strides = [1, 1, 1]} : vector<4x8x8xf32> to vector<1x8x8xf32>
    %89 = vector.shape_cast %88 : vector<1x8x8xf32> to vector<8x8xf32>
    %90 = vector.extract_strided_slice %53 {offsets = [3, 0, 0], sizes = [1, 8, 8], strides = [1, 1, 1]} : vector<4x8x8xf32> to vector<1x8x8xf32>
    %91 = vector.shape_cast %90 : vector<1x8x8xf32> to vector<8x8xf32>
    %92 = tpu.concatenate %85, %87, %89, %91 in 1 : vector<8x8xf32>, vector<8x8xf32>, vector<8x8xf32>, vector<8x8xf32> -> vector<8x32xf32>
    %93 = vector.extract_strided_slice %92 {offsets = [0, 0], sizes = [1, 32], strides = [1, 1]} : vector<8x32xf32> to vector<1x32xf32>
    %94 = vector.extract_strided_slice %92 {offsets = [1, 0], sizes = [1, 32], strides = [1, 1]} : vector<8x32xf32> to vector<1x32xf32>
    %95 = vector.extract_strided_slice %92 {offsets = [2, 0], sizes = [1, 32], strides = [1, 1]} : vector<8x32xf32> to vector<1x32xf32>
    %96 = vector.extract_strided_slice %92 {offsets = [3, 0], sizes = [1, 32], strides = [1, 1]} : vector<8x32xf32> to vector<1x32xf32>
    %97 = vector.extract_strided_slice %92 {offsets = [4, 0], sizes = [1, 32], strides = [1, 1]} : vector<8x32xf32> to vector<1x32xf32>
    %98 = vector.extract_strided_slice %92 {offsets = [5, 0], sizes = [1, 32], strides = [1, 1]} : vector<8x32xf32> to vector<1x32xf32>
    %99 = vector.extract_strided_slice %92 {offsets = [6, 0], sizes = [1, 32], strides = [1, 1]} : vector<8x32xf32> to vector<1x32xf32>
    %100 = vector.extract_strided_slice %92 {offsets = [7, 0], sizes = [1, 32], strides = [1, 1]} : vector<8x32xf32> to vector<1x32xf32>
    %101 = tpu.concatenate %93, %94, %95, %96, %97, %98, %99, %100 in 1 : vector<1x32xf32>, vector<1x32xf32>, vector<1x32xf32>, vector<1x32xf32>, vector<1x32xf32>, vector<1x32xf32>, vector<1x32xf32>, vector<1x32xf32> -> vector<1x256xf32>
    %c0_22 = arith.constant 0 : index
    %c0_23 = arith.constant 0 : index
    %c0_24 = arith.constant 0 : index
    %102 = vector.load %arg13[%c0_22, %c0_23, %c0_24] : memref<1x1x256xf32, #tpu.memory_space<vmem>>, vector<1x1x256xf32>
    %103 = vector.shape_cast %102 : vector<1x1x256xf32> to vector<1x256xf32>
    %104 = vector.shape_cast %101 : vector<1x256xf32> to vector<1x1x256xf32>
    tpu.vector_store %arg13[%c0_22, %c0_23, %c0_24], %104 {strides = array<i32>} : memref<1x1x256xf32, #tpu.memory_space<vmem>>, vector<1x1x256xf32>,
    %c0_25 = arith.constant 0 : index
    %c0_26 = arith.constant 0 : index
    %105 = vector.load %arg7[%c0_25, %c0_26] : memref<32x32xf32, #tpu.memory_space<vmem>>, vector<32x32xf32>
    %cst_27 = arith.constant dense<0.000000e+00> : vector<8x32xf32>
    %106 = tpu.matmul %83, %105, %cst_27 {dimension_numbers = #tpu.dot_dimension_numbers<[1], [0], [0], [1], [0, 0, 1, 1], [], []>} : vector<8x32xf32>, vector<32x32xf32>, vector<8x32xf32> -> vector<8x32xf32>
    %c0_28 = arith.constant 0 : index
    %c0_29 = arith.constant 0 : index
    %107 = vector.load %arg8[%c0_28, %c0_29] : memref<32x64xf32, #tpu.memory_space<vmem>>, vector<32x64xf32>
    %cst_30 = arith.constant dense<0.000000e+00> : vector<8x64xf32>
    %108 = tpu.matmul %3, %107, %cst_30 {dimension_numbers = #tpu.dot_dimension_numbers<[1], [0], [0], [1], [0, 0, 1, 1], [], []>} : vector<8x32xf32>, vector<32x64xf32>, vector<8x64xf32> -> vector<8x64xf32>
    %c0_31 = arith.constant 0 : index
    %c0_32 = arith.constant 0 : index
    %c0_33 = arith.constant 0 : index
    %109 = vector.load %arg4[%c0_31, %c0_32, %c0_33] : memref<1x8x8xf32, #tpu.memory_space<vmem>>, vector<1x8x8xf32>
    %110 = vector.shape_cast %109 : vector<1x8x8xf32> to vector<8x8xf32>
    %c0_34 = arith.constant 0 : index
    %c0_35 = arith.constant 0 : index
    %111 = vector.load %arg9[%c0_34, %c0_35] : memref<32x32xf32, #tpu.memory_space<vmem>>, vector<32x32xf32>
    %112 = vector.extract_strided_slice %108 {offsets = [0, 0], sizes = [8, 32], strides = [1, 1]} : vector<8x64xf32> to vector<8x32xf32>
    %113 = vector.extract_strided_slice %108 {offsets = [0, 32], sizes = [8, 32], strides = [1, 1]} : vector<8x64xf32> to vector<8x32xf32>
    %114 = vector.extract_strided_slice %106 {offsets = [0, 0], sizes = [8, 8], strides = [1, 1]} : vector<8x32xf32> to vector<8x8xf32>
    %115 = vector.extract_strided_slice %106 {offsets = [0, 8], sizes = [8, 8], strides = [1, 1]} : vector<8x32xf32> to vector<8x8xf32>
    %116 = vector.extract_strided_slice %106 {offsets = [0, 16], sizes = [8, 8], strides = [1, 1]} : vector<8x32xf32> to vector<8x8xf32>
    %117 = vector.extract_strided_slice %106 {offsets = [0, 24], sizes = [8, 8], strides = [1, 1]} : vector<8x32xf32> to vector<8x8xf32>
    %118 = vector.shape_cast %114 : vector<8x8xf32> to vector<1x8x8xf32>
    %119 = vector.shape_cast %115 : vector<8x8xf32> to vector<1x8x8xf32>
    %120 = vector.shape_cast %116 : vector<8x8xf32> to vector<1x8x8xf32>
    %121 = vector.shape_cast %117 : vector<8x8xf32> to vector<1x8x8xf32>
    %122 = tpu.concatenate %118, %119, %120, %121 in 0 : vector<1x8x8xf32>, vector<1x8x8xf32>, vector<1x8x8xf32>, vector<1x8x8xf32> -> vector<4x8x8xf32>
    %123 = vector.extract_strided_slice %112 {offsets = [0, 0], sizes = [8, 8], strides = [1, 1]} : vector<8x32xf32> to vector<8x8xf32>
    %124 = vector.extract_strided_slice %112 {offsets = [0, 8], sizes = [8, 8], strides = [1, 1]} : vector<8x32xf32> to vector<8x8xf32>
    %125 = vector.extract_strided_slice %112 {offsets = [0, 16], sizes = [8, 8], strides = [1, 1]} : vector<8x32xf32> to vector<8x8xf32>
    %126 = vector.extract_strided_slice %112 {offsets = [0, 24], sizes = [8, 8], strides = [1, 1]} : vector<8x32xf32> to vector<8x8xf32>
    %127 = vector.shape_cast %123 : vector<8x8xf32> to vector<1x8x8xf32>
    %128 = vector.shape_cast %124 : vector<8x8xf32> to vector<1x8x8xf32>
    %129 = vector.shape_cast %125 : vector<8x8xf32> to vector<1x8x8xf32>
    %130 = vector.shape_cast %126 : vector<8x8xf32> to vector<1x8x8xf32>
    %131 = tpu.concatenate %127, %128, %129, %130 in 0 : vector<1x8x8xf32>, vector<1x8x8xf32>, vector<1x8x8xf32>, vector<1x8x8xf32> -> vector<4x8x8xf32>
    %132 = vector.extract_strided_slice %113 {offsets = [0, 0], sizes = [8, 8], strides = [1, 1]} : vector<8x32xf32> to vector<8x8xf32>
    %133 = vector.extract_strided_slice %113 {offsets = [0, 8], sizes = [8, 8], strides = [1, 1]} : vector<8x32xf32> to vector<8x8xf32>
    %134 = vector.extract_strided_slice %113 {offsets = [0, 16], sizes = [8, 8], strides = [1, 1]} : vector<8x32xf32> to vector<8x8xf32>
    %135 = vector.extract_strided_slice %113 {offsets = [0, 24], sizes = [8, 8], strides = [1, 1]} : vector<8x32xf32> to vector<8x8xf32>
    %136 = vector.shape_cast %132 : vector<8x8xf32> to vector<1x8x8xf32>
    %137 = vector.shape_cast %133 : vector<8x8xf32> to vector<1x8x8xf32>
    %138 = vector.shape_cast %134 : vector<8x8xf32> to vector<1x8x8xf32>
    %139 = vector.shape_cast %135 : vector<8x8xf32> to vector<1x8x8xf32>
    %140 = tpu.concatenate %136, %137, %138, %139 in 0 : vector<1x8x8xf32>, vector<1x8x8xf32>, vector<1x8x8xf32>, vector<1x8x8xf32> -> vector<4x8x8xf32>
    "tpu.trace_start"() <{level = 10 : i32, message = "hqd,hkd->hqk"}> : () -> ()
    %cst_36 = arith.constant dense<0.000000e+00> : vector<4x8x8xf32>
    %141 = tpu.matmul %122, %131, %cst_36 {dimension_numbers = #tpu.dot_dimension_numbers<[2], [2], [1], [1], [0, 0, 0, 1, 1, 1], [0], [0]>} : vector<4x8x8xf32>, vector<4x8x8xf32>, vector<4x8x8xf32> -> vector<4x8x8xf32>
    "tpu.trace_stop"() : () -> ()
    %142 = vector.shape_cast %110 : vector<8x8xf32> to vector<1x8x8xf32>
    %143 = vector.broadcast %142 : vector<1x8x8xf32> to vector<4x8x8xf32>
    %144 = arith.addf %141, %143 : vector<4x8x8xf32>
    %cst_37 = arith.constant dense<0xFF800000> : vector<4x8xf32>
    %145 = vector.multi_reduction <maximumf>, %144, %cst_37 [2] : vector<4x8x8xf32> to vector<4x8xf32>
    %146 = vector.shape_cast %145 : vector<4x8xf32> to vector<4x8x1xf32>
    %147 = vector.broadcast %146 : vector<4x8x1xf32> to vector<4x8x8xf32>
    %148 = arith.subf %144, %147 : vector<4x8x8xf32>
    %149 = math.exp %148 : vector<4x8x8xf32>
    %cst_38 = arith.constant dense<0.000000e+00> : vector<4x8xf32>
    %150 = vector.multi_reduction <add>, %149, %cst_38 [2] : vector<4x8x8xf32> to vector<4x8xf32>
    %151 = vector.shape_cast %150 : vector<4x8xf32> to vector<4x8x1xf32>
    %152 = tpu.reciprocal %151 {approx = true} : vector<4x8x1xf32> -> vector<4x8x1xf32>
    %153 = vector.broadcast %152 : vector<4x8x1xf32> to vector<4x8x8xf32>
    %154 = arith.mulf %149, %153 : vector<4x8x8xf32>
    "tpu.trace_start"() <{level = 10 : i32, message = "hqk,hkd->hqd"}> : () -> ()
    %cst_39 = arith.constant dense<0.000000e+00> : vector<4x8x8xf32>
    %155 = tpu.matmul %154, %140, %cst_39 {dimension_numbers = #tpu.dot_dimension_numbers<[2], [1], [1], [2], [0, 0, 0, 1, 1, 2], [0], [0]>} : vector<4x8x8xf32>, vector<4x8x8xf32>, vector<4x8x8xf32> -> vector<4x8x8xf32>
    "tpu.trace_stop"() : () -> ()
    %156 = vector.extract_strided_slice %155 {offsets = [0, 0, 0], sizes = [1, 8, 8], strides = [1, 1, 1]} : vector<4x8x8xf32> to vector<1x8x8xf32>
    %157 = vector.shape_cast %156 : vector<1x8x8xf32> to vector<8x8xf32>
    %158 = vector.extract_strided_slice %155 {offsets = [1, 0, 0], sizes = [1, 8, 8], strides = [1, 1, 1]} : vector<4x8x8xf32> to vector<1x8x8xf32>
    %159 = vector.shape_cast %158 : vector<1x8x8xf32> to vector<8x8xf32>
    %160 = vector.extract_strided_slice %155 {offsets = [2, 0, 0], sizes = [1, 8, 8], strides = [1, 1, 1]} : vector<4x8x8xf32> to vector<1x8x8xf32>
    %161 = vector.shape_cast %160 : vector<1x8x8xf32> to vector<8x8xf32>
    %162 = vector.extract_strided_slice %155 {offsets = [3, 0, 0], sizes = [1, 8, 8], strides = [1, 1, 1]} : vector<4x8x8xf32> to vector<1x8x8xf32>
    %163 = vector.shape_cast %162 : vector<1x8x8xf32> to vector<8x8xf32>
    %164 = tpu.concatenate %157, %159, %161, %163 in 1 : vector<8x8xf32>, vector<8x8xf32>, vector<8x8xf32>, vector<8x8xf32> -> vector<8x32xf32>
    %cst_40 = arith.constant dense<0.000000e+00> : vector<8x32xf32>
    %165 = tpu.matmul %164, %111, %cst_40 {dimension_numbers = #tpu.dot_dimension_numbers<[1], [0], [0], [1], [0, 0, 1, 1], [], []>} : vector<8x32xf32>, vector<32x32xf32>, vector<8x32xf32> -> vector<8x32xf32>
    %166 = arith.addf %165, %83 : vector<8x32xf32>
    %cst_41 = arith.constant dense<0.000000e+00> : vector<8xf32>
    %167 = vector.multi_reduction <add>, %166, %cst_41 [1] : vector<8x32xf32> to vector<8xf32>
    %168 = vector.shape_cast %167 : vector<8xf32> to vector<8x1xf32>
    %cst_42 = arith.constant 3.200000e+01 : f32
    %169 = vector.broadcast %cst_42 : f32 to vector<8x1xf32>
    %170 = arith.divf %168, %169 : vector<8x1xf32>
    %171 = vector.broadcast %170 : vector<8x1xf32> to vector<8x32xf32>
    %172 = arith.subf %166, %171 : vector<8x32xf32>
    %173 = arith.mulf %172, %172 : vector<8x32xf32>
    %cst_43 = arith.constant dense<0.000000e+00> : vector<8xf32>
    %174 = vector.multi_reduction <add>, %173, %cst_43 [1] : vector<8x32xf32> to vector<8xf32>
    %175 = vector.shape_cast %174 : vector<8xf32> to vector<8x1xf32>
    %cst_44 = arith.constant 3.200000e+01 : f32
    %176 = vector.broadcast %cst_44 : f32 to vector<8x1xf32>
    %177 = arith.divf %175, %176 : vector<8x1xf32>
    %178 = vector.broadcast %170 : vector<8x1xf32> to vector<8x32xf32>
    %179 = arith.subf %166, %178 : vector<8x32xf32>
    %cst_45 = arith.constant 9.99999974E-6 : f32
    %180 = vector.broadcast %cst_45 : f32 to vector<8x1xf32>
    %181 = arith.addf %177, %180 : vector<8x1xf32>
    %182 = math.rsqrt %181 : vector<8x1xf32>
    %183 = vector.broadcast %182 : vector<8x1xf32> to vector<8x32xf32>
    %184 = arith.mulf %179, %183 : vector<8x32xf32>
    %185 = vector.extract_strided_slice %154 {offsets = [0, 0, 0], sizes = [1, 8, 8], strides = [1, 1, 1]} : vector<4x8x8xf32> to vector<1x8x8xf32>
    %186 = vector.shape_cast %185 : vector<1x8x8xf32> to vector<8x8xf32>
    %187 = vector.extract_strided_slice %154 {offsets = [1, 0, 0], sizes = [1, 8, 8], strides = [1, 1, 1]} : vector<4x8x8xf32> to vector<1x8x8xf32>
    %188 = vector.shape_cast %187 : vector<1x8x8xf32> to vector<8x8xf32>
    %189 = vector.extract_strided_slice %154 {offsets = [2, 0, 0], sizes = [1, 8, 8], strides = [1, 1, 1]} : vector<4x8x8xf32> to vector<1x8x8xf32>
    %190 = vector.shape_cast %189 : vector<1x8x8xf32> to vector<8x8xf32>
    %191 = vector.extract_strided_slice %154 {offsets = [3, 0, 0], sizes = [1, 8, 8], strides = [1, 1, 1]} : vector<4x8x8xf32> to vector<1x8x8xf32>
    %192 = vector.shape_cast %191 : vector<1x8x8xf32> to vector<8x8xf32>
    %193 = tpu.concatenate %186, %188, %190, %192 in 1 : vector<8x8xf32>, vector<8x8xf32>, vector<8x8xf32>, vector<8x8xf32> -> vector<8x32xf32>
    %194 = vector.extract_strided_slice %193 {offsets = [0, 0], sizes = [1, 32], strides = [1, 1]} : vector<8x32xf32> to vector<1x32xf32>
    %195 = vector.extract_strided_slice %193 {offsets = [1, 0], sizes = [1, 32], strides = [1, 1]} : vector<8x32xf32> to vector<1x32xf32>
    %196 = vector.extract_strided_slice %193 {offsets = [2, 0], sizes = [1, 32], strides = [1, 1]} : vector<8x32xf32> to vector<1x32xf32>
    %197 = vector.extract_strided_slice %193 {offsets = [3, 0], sizes = [1, 32], strides = [1, 1]} : vector<8x32xf32> to vector<1x32xf32>
    %198 = vector.extract_strided_slice %193 {offsets = [4, 0], sizes = [1, 32], strides = [1, 1]} : vector<8x32xf32> to vector<1x32xf32>
    %199 = vector.extract_strided_slice %193 {offsets = [5, 0], sizes = [1, 32], strides = [1, 1]} : vector<8x32xf32> to vector<1x32xf32>
    %200 = vector.extract_strided_slice %193 {offsets = [6, 0], sizes = [1, 32], strides = [1, 1]} : vector<8x32xf32> to vector<1x32xf32>
    %201 = vector.extract_strided_slice %193 {offsets = [7, 0], sizes = [1, 32], strides = [1, 1]} : vector<8x32xf32> to vector<1x32xf32>
    %202 = tpu.concatenate %194, %195, %196, %197, %198, %199, %200, %201 in 1 : vector<1x32xf32>, vector<1x32xf32>, vector<1x32xf32>, vector<1x32xf32>, vector<1x32xf32>, vector<1x32xf32>, vector<1x32xf32>, vector<1x32xf32> -> vector<1x256xf32>
    %c0_46 = arith.constant 0 : index
    %c0_47 = arith.constant 0 : index
    %c0_48 = arith.constant 0 : index
    %203 = vector.load %arg14[%c0_46, %c0_47, %c0_48] : memref<1x1x256xf32, #tpu.memory_space<vmem>>, vector<1x1x256xf32>
    %204 = vector.shape_cast %203 : vector<1x1x256xf32> to vector<1x256xf32>
    %205 = vector.shape_cast %202 : vector<1x256xf32> to vector<1x1x256xf32>
    tpu.vector_store %arg14[%c0_46, %c0_47, %c0_48], %205 {strides = array<i32>} : memref<1x1x256xf32, #tpu.memory_space<vmem>>, vector<1x1x256xf32>,
    %c0_49 = arith.constant 0 : index
    %c0_50 = arith.constant 0 : index
    %206 = vector.load %arg10[%c0_49, %c0_50] : memref<32x64xf32, #tpu.memory_space<vmem>>, vector<32x64xf32>
    %cst_51 = arith.constant dense<0.000000e+00> : vector<8x64xf32>
    %207 = tpu.matmul %184, %206, %cst_51 {dimension_numbers = #tpu.dot_dimension_numbers<[1], [0], [0], [1], [0, 0, 1, 1], [], []>} : vector<8x32xf32>, vector<32x64xf32>, vector<8x64xf32> -> vector<8x64xf32>
    %cst_52 = arith.constant 0.000000e+00 : f32
    %208 = vector.broadcast %cst_52 : f32 to vector<8x64xf32>
    %209 = arith.maximumf %207, %208 : vector<8x64xf32>
    %c0_53 = arith.constant 0 : index
    %c0_54 = arith.constant 0 : index
    %210 = vector.load %arg11[%c0_53, %c0_54] : memref<64x32xf32, #tpu.memory_space<vmem>>, vector<64x32xf32>
    %cst_55 = arith.constant dense<0.000000e+00> : vector<8x32xf32>
    %211 = tpu.matmul %209, %210, %cst_55 {dimension_numbers = #tpu.dot_dimension_numbers<[1], [0], [0], [1], [0, 0, 1, 1], [], []>} : vector<8x64xf32>, vector<64x32xf32>, vector<8x32xf32> -> vector<8x32xf32>
    %212 = arith.addf %211, %184 : vector<8x32xf32>
    %cst_56 = arith.constant dense<0.000000e+00> : vector<8xf32>
    %213 = vector.multi_reduction <add>, %212, %cst_56 [1] : vector<8x32xf32> to vector<8xf32>
    %214 = vector.shape_cast %213 : vector<8xf32> to vector<8x1xf32>
    %cst_57 = arith.constant 3.200000e+01 : f32
    %215 = vector.broadcast %cst_57 : f32 to vector<8x1xf32>
    %216 = arith.divf %214, %215 : vector<8x1xf32>
    %217 = vector.broadcast %216 : vector<8x1xf32> to vector<8x32xf32>
    %218 = arith.subf %212, %217 : vector<8x32xf32>
    %219 = arith.mulf %218, %218 : vector<8x32xf32>
    %cst_58 = arith.constant dense<0.000000e+00> : vector<8xf32>
    %220 = vector.multi_reduction <add>, %219, %cst_58 [1] : vector<8x32xf32> to vector<8xf32>
    %221 = vector.shape_cast %220 : vector<8xf32> to vector<8x1xf32>
    %cst_59 = arith.constant 3.200000e+01 : f32
    %222 = vector.broadcast %cst_59 : f32 to vector<8x1xf32>
    %223 = arith.divf %221, %222 : vector<8x1xf32>
    %224 = vector.broadcast %216 : vector<8x1xf32> to vector<8x32xf32>
    %225 = arith.subf %212, %224 : vector<8x32xf32>
    %cst_60 = arith.constant 9.99999974E-6 : f32
    %226 = vector.broadcast %cst_60 : f32 to vector<8x1xf32>
    %227 = arith.addf %223, %226 : vector<8x1xf32>
    %228 = math.rsqrt %227 : vector<8x1xf32>
    %229 = vector.broadcast %228 : vector<8x1xf32> to vector<8x32xf32>
    %230 = arith.mulf %225, %229 : vector<8x32xf32>
    %231 = vector.extract_strided_slice %230 {offsets = [0, 0], sizes = [1, 32], strides = [1, 1]} : vector<8x32xf32> to vector<1x32xf32>
    %232 = vector.extract_strided_slice %230 {offsets = [1, 0], sizes = [1, 32], strides = [1, 1]} : vector<8x32xf32> to vector<1x32xf32>
    %233 = vector.extract_strided_slice %230 {offsets = [2, 0], sizes = [1, 32], strides = [1, 1]} : vector<8x32xf32> to vector<1x32xf32>
    %234 = vector.extract_strided_slice %230 {offsets = [3, 0], sizes = [1, 32], strides = [1, 1]} : vector<8x32xf32> to vector<1x32xf32>
    %235 = vector.extract_strided_slice %230 {offsets = [4, 0], sizes = [1, 32], strides = [1, 1]} : vector<8x32xf32> to vector<1x32xf32>
    %236 = vector.extract_strided_slice %230 {offsets = [5, 0], sizes = [1, 32], strides = [1, 1]} : vector<8x32xf32> to vector<1x32xf32>
    %237 = vector.extract_strided_slice %230 {offsets = [6, 0], sizes = [1, 32], strides = [1, 1]} : vector<8x32xf32> to vector<1x32xf32>
    %238 = vector.extract_strided_slice %230 {offsets = [7, 0], sizes = [1, 32], strides = [1, 1]} : vector<8x32xf32> to vector<1x32xf32>
    %239 = tpu.concatenate %231, %232, %233, %234, %235, %236, %237, %238 in 1 : vector<1x32xf32>, vector<1x32xf32>, vector<1x32xf32>, vector<1x32xf32>, vector<1x32xf32>, vector<1x32xf32>, vector<1x32xf32>, vector<1x32xf32> -> vector<1x256xf32>
    %c0_61 = arith.constant 0 : index
    %c0_62 = arith.constant 0 : index
    %c0_63 = arith.constant 0 : index
    %240 = vector.load %arg12[%c0_61, %c0_62, %c0_63] : memref<1x1x256xf32, #tpu.memory_space<vmem>>, vector<1x1x256xf32>
    %241 = vector.shape_cast %240 : vector<1x1x256xf32> to vector<1x256xf32>
    %242 = vector.shape_cast %239 : vector<1x256xf32> to vector<1x1x256xf32>
    tpu.vector_store %arg12[%c0_61, %c0_62, %c0_63], %242 {strides = array<i32>} : memref<1x1x256xf32, #tpu.memory_space<vmem>>, vector<1x1x256xf32>,
    return
  }
  func.func @transform_0(%arg0: i32) -> (i32, i32, i32) {
    %c0_i32 = arith.constant 0 : i32
    %c0_i32_0 = arith.constant 0 : i32
    %c0_i32_1 = arith.constant 0 : i32
    return %arg0, %c0_i32, %c0_i32_0 : i32, i32, i32
  }
  func.func @transform_1(%arg0: i32) -> (i32, i32, i32) {
    %c0_i32 = arith.constant 0 : i32
    %c0_i32_0 = arith.constant 0 : i32
    %c0_i32_1 = arith.constant 0 : i32
    return %arg0, %c0_i32, %c0_i32_0 : i32, i32, i32
  }
  func.func @transform_2(%arg0: i32) -> (i32, i32, i32) {
    %c0_i32 = arith.constant 0 : i32
    %c0_i32_0 = arith.constant 0 : i32
    %c0_i32_1 = arith.constant 0 : i32
    return %arg0, %c0_i32, %c0_i32_0 : i32, i32, i32
  }
  func.func @transform_3(%arg0: i32) -> (i32, i32, i32) {
    %c0_i32 = arith.constant 0 : i32
    %c0_i32_0 = arith.constant 0 : i32
    %c0_i32_1 = arith.constant 0 : i32
    return %arg0, %c0_i32, %c0_i32_0 : i32, i32, i32
  }
  func.func @transform_4(%arg0: i32) -> (i32, i32) {
    %c0_i32 = arith.constant 0 : i32
    %c0_i32_0 = arith.constant 0 : i32
    %c0_i32_1 = arith.constant 0 : i32
    return %c0_i32, %c0_i32_0 : i32, i32
  }
  func.func @transform_5(%arg0: i32) -> (i32, i32) {
    %c0_i32 = arith.constant 0 : i32
    %c0_i32_0 = arith.constant 0 : i32
    %c0_i32_1 = arith.constant 0 : i32
    return %c0_i32, %c0_i32_0 : i32, i32
  }
  func.func @transform_6(%arg0: i32) -> (i32, i32) {
    %c0_i32 = arith.constant 0 : i32
    %c0_i32_0 = arith.constant 0 : i32
    %c0_i32_1 = arith.constant 0 : i32
    return %c0_i32, %c0_i32_0 : i32, i32
  }
  func.func @transform_7(%arg0: i32) -> (i32, i32) {
    %c0_i32 = arith.constant 0 : i32
    %c0_i32_0 = arith.constant 0 : i32
    %c0_i32_1 = arith.constant 0 : i32
    return %c0_i32, %c0_i32_0 : i32, i32
  }
  func.func @transform_8(%arg0: i32) -> (i32, i32) {
    %c0_i32 = arith.constant 0 : i32
    %c0_i32_0 = arith.constant 0 : i32
    %c0_i32_1 = arith.constant 0 : i32
    return %c0_i32, %c0_i32_0 : i32, i32
  }
  func.func @transform_9(%arg0: i32) -> (i32, i32) {
    %c0_i32 = arith.constant 0 : i32
    %c0_i32_0 = arith.constant 0 : i32
    %c0_i32_1 = arith.constant 0 : i32
    return %c0_i32, %c0_i32_0 : i32, i32
  }
  func.func @transform_10(%arg0: i32) -> (i32, i32) {
    %c0_i32 = arith.constant 0 : i32
    %c0_i32_0 = arith.constant 0 : i32
    %c0_i32_1 = arith.constant 0 : i32
    return %c0_i32, %c0_i32_0 : i32, i32
  }
  func.func @transform_11(%arg0: i32) -> (i32, i32, i32) {
    %c0_i32 = arith.constant 0 : i32
    %c0_i32_0 = arith.constant 0 : i32
    %c0_i32_1 = arith.constant 0 : i32
    return %arg0, %c0_i32, %c0_i32_0 : i32, i32, i32
  }
  func.func @transform_12(%arg0: i32) -> (i32, i32, i32) {
    %c0_i32 = arith.constant 0 : i32
    %c0_i32_0 = arith.constant 0 : i32
    %c0_i32_1 = arith.constant 0 : i32
    return %arg0, %c0_i32, %c0_i32_0 : i32, i32, i32
  }
  func.func @transform_13(%arg0: i32) -> (i32, i32, i32) {
    %c0_i32 = arith.constant 0 : i32
    %c0_i32_0 = arith.constant 0 : i32
    %c0_i32_1 = arith.constant 0 : i32
    return %arg0, %c0_i32, %c0_i32_0 : i32, i32, i32
  }
}

</mosaic_0001>

<bundles_post_ra>
// kernel: tpu_custom_call.1
= control target key start
LH: loop header
LB: loop body
LE: loop exit
PB: predicated region body
PF: predicated region fallthrough
CT: control target
= control target key end

     0   :  { %s4681_s0 = inlined_call_operand.hbm [shape: f32[2,8,32], index: 0, kind: input, shape index: {}]   ;;  %s4682_s1 = inlined_call_operand.hbm [shape: f32[2,8,32], index: 1, kind: input, shape index: {}]   ;;  %s4683_s2 = inlined_call_operand.hbm [shape: f32[2,8,8], index: 2, kind: input, shape index: {}]   ;;  %s4684_s3 = inlined_call_operand.hbm [shape: f32[2,8,8], index: 3, kind: input, shape index: {}]   ;;  %s4685_s4 = inlined_call_operand.vmem [shape: f32[32,96], index: 4, kind: input, shape index: {}]   ;;  %s4686_s5 = inlined_call_operand.vmem [shape: f32[32,32], index: 5, kind: input, shape index: {}]   ;;  %s4687_s6 = inlined_call_operand.vmem [shape: f32[32,32], index: 6, kind: input, shape index: {}]   ;;  %s4688_s7 = inlined_call_operand.hbm [shape: f32[32,64], index: 7, kind: input, shape index: {}]   ;;  %s4689_s8 = inlined_call_operand.hbm [shape: f32[32,32], index: 8, kind: input, shape index: {}]   ;;  %s4690_s9 = inlined_call_operand.hbm [shape: f32[32,64], index: 9, kind: input, shape index: {}]   ;;  %s4691_s10 = inlined_call_operand.vmem [shape: f32[64,32], index: 10, kind: input, shape index: {}]   ;;  %s4692_s11 = inlined_call_operand.hbm [shape: f32[2,1,256], index: 11, kind: output, shape index: {0}]   ;;  %s4693_s12 = inlined_call_operand.hbm [shape: f32[2,1,256], index: 12, kind: output, shape index: {1}]   ;;  %s4694_s13 = inlined_call_operand.hbm [shape: f32[2,1,256], index: 13, kind: output, shape index: {2}]  }
   0x1   :  { %4718 = sst [smem:[#allocation30_spill]] %s4681_s0 }
   0x2   :  { %4719 = sst [smem:[#allocation31_spill]] %s4687_s6 }
   0x3   :  { %4720 = sst [smem:[#allocation32_spill]] %s4688_s7 }
   0x4   :  { %4721 = sst [smem:[#allocation33_spill]] %s4689_s8 }
   0x5   :  { %4722 = sst [smem:[#allocation34_spill]] %s4691_s10 }
   0x6   :  { %4723 = sst [smem:[#allocation35_spill]] %s4692_s11 }
   0x7   :  { %4724 = sst [smem:[#allocation36_spill]] %s4693_s12 }
   0x8   :  { %4725 = sst [smem:[#allocation37_spill]] %s4694_s13 }
   0x9   :  { %19 = vsyncpa [#allocation3], 0 }
   0xa   :  { %21 = vsyncpa [#allocation3 + $0x1], 0 }
   0xb   :  { %22 = vsyncpa [#allocation6], 0 }
   0xc   :  { %24 = vsyncpa [#allocation6 + $0x1], 0 }
   0xd   :  { %25 = vsyncpa [#allocation9], 0 }
   0xe   :  { %27 = vsyncpa [#allocation9 + $0x1], 0 }
   0xf   :  { %28 = vsyncpa [#allocation12], 0 }
  0x10   :  { %29 = vsyncpa [#allocation4], 0 }
  0x11   :  { %31 = vsyncpa [#allocation4 + $0x1], 0 }
  0x12   :  { %32 = vsyncpa [#allocation16], 0 }
  0x13   :  { %34 = vsyncpa [#allocation16 + $0x1], 0  ;;  %s3910_s25 = smov 0   ;;  %s3912_s26 = smov 0  }
  0x14   :  { %s3914_s27 = smov 0   ;;  %s3916_s28 = smov 0  }
  0x15 LB: > { %4726 = sst [smem:[#allocation25_spill]] %s3802_s25  ;;  %s3931_s29 = sadd.s32 4294967295, %s3814_s28   ;;  %s3814_s28 = sphi %s3916_s28, %s4767_s28   ;;  %s3810_s27 = sphi %s3914_s27, %s4771_s27   ;;  %s3806_s26 = sphi %s3912_s26, %s4770_s26   ;;  %s3802_s25 = sphi %s3910_s25, %s4769_s25  }
  0x16   : > { %s4695_s30 = sadd.s32 4294967294, %s3814_s28   ;;  %p60_p0 = scmp.ne.s32.totalorder %s3806_s26, %s3802_s25 }
  0x17   : > { %p4706_p1 = scmp.eq.s32.totalorder %s3931_s29, 0  ;;  %p309_p2 = scmp.eq.s32.totalorder %s3931_s29, 1 }
  0x18   : > { %p315_p3 = scmp.eq.s32.totalorder %s4695_s30, 1  ;;  %p3029_p5 = scmp.ge.s32.totalorder %s3814_s28, 1 }
  0x19   : > { %p3942_p4 = por %p4706_p1, %p60_p0  ;;  %p374_p7 = scmp.lt.s32.totalorder %s3814_s28, 3 }
  0x1a   : > { %p3947_p6 = por %p315_p3, %p60_p0  ;;  %s3816_s17 = smov [#allocation10]  }
  0x1b   : > { %s4727_s14 = scalar_select %p3942_p4, 1, 0 }
  0x1c   : > { %s4728_s15 = scalar_select %p3947_p6, 1, 0 }
  0x1d   : > { %p3952_p8 = pnand %p3029_p5, %p374_p7  ;;  %s395_s18 = sshll.u32 %s3816_s17, 4  ;;  %s396_s18 = int_to_ptr.vmem [resolvable:$true] %s395_s18 }
  0x1e   : > { %4729 = sst [smem:[#allocation26_spill]] %s4728_s15  ;;  %s3817_s20 = smov [#allocation11]  }
  0x1f   : > { %s4730_s16 = scalar_select %p3952_p8, 1, 0 }
  0x20   : > { %p3360_p9 = pneg %p3952_p8  ;;  %s408_s21 = sshll.u32 %s3817_s20, 4  ;;  %s409_s21 = int_to_ptr.vmem [resolvable:$true] %s408_s21 }
  0x21   : > { %s3499_s22 = scalar_lea.vmem %s396_s18, 512  ;;  %p3507_p5 = scmp.lt.s32.totalorder %s396_s18, %s396_s18 }
  0x22   : > { %p3961_p11 = pnand %p3360_p9, %p4706_p1  ;;  %p3500_p13 = scmp.ne.s32.totalorder %s396_s18, %s3499_s22 }
  0x23   : > { %p3508_p7 = scmp.lt.s32.totalorder %s3499_s22, %s3499_s22 }
  0x24   : > { %s4731_s19 = scalar_select %p3961_p11, 1, 0 }
  0x25   : > { %p4707_p12 = pneg %p3961_p11  ;;  %p3509_p10 = por %p3508_p7, %p3507_p5 }
  0x27   : > { %p3502_p0 = pnand %p3500_p13, %p4707_p12 }
  0x29   : > { %p3503_p3 = pneg %p3502_p0 }
  0x2b   : > { %p3510_p9 = pnand %p3509_p10, %p3503_p3 }
  0x2d   : > { %3513 = shalt.err (!%p3510_p9)
}
  0x2e   : > { %s4697_s23 = smov 128   ;;  %s4698_s24 = smov 8  }
  0x2f   : > { %s4732_s7 = sld [smem:[#allocation32_spill]]  ;;  %s3525_s30 = scalar_lea.vmem %s409_s21, 512 }
  0x30   : > { %p3526_p13 = scmp.ne.s32.totalorder %s409_s21, %s3525_s30  ;;  %p3533_p10 = scmp.lt.s32.totalorder %s409_s21, %s409_s21 }
  0x31   : > { %p3534_p3 = scmp.lt.s32.totalorder %s3525_s30, %s3525_s30 }
  0x32   : > { %p3528_p0 = pnand %p3526_p13, %p4707_p12 }
  0x33   : > { %p3535_p7 = por %p3534_p3, %p3533_p10 }
  0x34   : > { %p3529_p5 = pneg %p3528_p0 }
  0x35   : > { %3363 = dma.hbm_to_vmem [thread:$0]  (!%p3961_p11), %s4732_s7, 512, %s396_s18, [#allocation9], %s4697_s23, %s4697_s23, %s4698_s24  }
  0x36   : > { %p3536_p9 = pnand %p3535_p7, %p3529_p5 }
  0x38   : > { %3539 = shalt.err (!%p3536_p9)
}
  0x39   : > { %s4733_s8 = sld [smem:[#allocation33_spill]]  ;;  %s3990_s30 = sadd.s32 1, %s3814_s28  }
  0x3a   : > { %4734 = sst [smem:[#allocation27_spill]] %s3990_s30  ;;  %s47_s18 = sadd.s32 1, %s3810_s27 }
  0x3b   : > { %s44_s17 = ssub.s32 %s3814_s28, %s3990_s30  ;;  %p54_p13 = scmp.ne.s32.totalorder %s3810_s27, %s3806_s26 }
  0x3c   : > { %p45_p0 = scmp.eq.s32.totalorder %s44_s17, 0  ;;  %p55_p5 = scmp.eq.s32.totalorder %s3814_s28, 0 }
  0x3d   : > { %p4000_p10 = por %p309_p2, %p54_p13  ;;  %p3396_p3 = scmp.lt.s32.totalorder %s3814_s28, 2 }
  0x3e   : > { %s4006_s20 = scalar_select %p45_p0, %s3810_s27, %s47_s18  }
  0x3f   : > { %3366 = dma.hbm_to_vmem [thread:$0]  (!%p3961_p11), %s4733_s8, 512, %s409_s21, [#allocation12], %s4697_s23, %s4697_s23, %s4698_s24  }
  0x40   : > { %s4735_s15 = scalar_select %p4000_p10, 1, 0 }
  0x41   : > { %4737 = sst [smem:[#allocation29_spill]] %s4006_s20  ;;  %p56_p7 = por %p55_p5, %p54_p13 }
  0x42   : > { %4736 = sst [smem:[#allocation28_spill]] %s4735_s15  ;;  %s4699_s22 = sand.u32 1, %s3810_s27  }
  0x43   : > { %s4011_s21 = sshll.u32 %s4699_s22, 3  ;;  %s4014_s23 = sshll.u32 %s3814_s28, 7 }
  0x44   : > { %p4016_p9 = pnand %p3396_p3, %p56_p7  ;;  %s4708_s24 = sand.u32 1, %s3814_s28  }
  0x45   : > { %s4025_s18 = scalar_lea.hbm %s4682_s1, %s4014_s23  ;;  %s460_s22 = scalar_lea.vmem [#allocation5], %s4011_s21 }
  0x46   : > { %s467_s20 = sshll.u32 %s460_s22, 4  ;;  %s4030_s30 = scalar_lea.sflag [#allocation6], %s4708_s24  ;;  %s468_s20 = int_to_ptr.vmem [resolvable:$true] %s467_s20 }
  0x47   : > { %s3540_s25 = scalar_lea.hbm %s4025_s18, 128  ;;  %p4036_p13 = pneg %p4016_p9 }
  0x48   : > { %p3541_p2 = scmp.ne.s32.totalorder %s4025_s18, %s3540_s25  ;;  %s3545_s13 = scalar_lea.hbm %s4682_s1, 256 }
  0x49   : > { %p3546_p3 = scmp.lt.s32.totalorder %s4025_s18, %s4682_s1  ;;  %p3547_p7 = scmp.lt.s32.totalorder %s3545_s13, %s3540_s25 }
  0x4a   : > { %p3543_p0 = pnand %p4036_p13, %p3541_p2 }
  0x4b   : > { %p3548_p1 = por %p3547_p7, %p3546_p3 }
  0x4c   : > { %p3544_p5 = pneg %p3543_p0 }
  0x4e   : > { %p3549_p12 = pnand %p3548_p1, %p3544_p5 }
  0x50   : > { %3552 = shalt.err (!%p3549_p12)
}
  0x51   : > { %s3553_s24 = scalar_lea.vmem %s468_s20, 128  ;;  %s3820_s15 = smov [#allocation5]  }
  0x52   : > { %p3554_p6 = scmp.ne.s32.totalorder %s468_s20, %s3553_s24  ;;  %s3558_s10 = sshll.u32 %s3820_s15, 4  ;;  %s3559_s10 = int_to_ptr.vmem [resolvable:$false] %s3558_s10 }
  0x53   : > { %s3560_s6 = scalar_lea.vmem %s3559_s10, 256  ;;  %p3561_p2 = scmp.lt.s32.totalorder %s468_s20, %s3559_s10 }
  0x54   : > { %p3556_p10 = pnand %p3554_p6, %p4036_p13  ;;  %p3562_p0 = scmp.lt.s32.totalorder %s3560_s6, %s3553_s24 }
  0x56   : > { %p3557_p4 = pneg %p3556_p10  ;;  %p3563_p8 = por %p3562_p0, %p3561_p2 }
  0x58   : > { %p3564_p11 = pnand %p3563_p8, %p3557_p4 }
  0x5a   : > { %3567 = shalt.err (!%p3564_p11)
}
  0x5b   : > { %3376 = dma.hbm_to_vmem [thread:$0]  (!%p4016_p9), %s4025_s18, 128, %s468_s20, %s4030_s30  }
  0x5c   : > { %s3821_s12 = smov [#allocation13]   ;;  %p4740_p6 = scmp.ne.s32.totalorder %s4731_s19, 0 }
  0x5d   : > { %s421_s13 = sshll.u32 %s3821_s12, 4  ;;  %s422_s13 = int_to_ptr.vmem [resolvable:$true] %s421_s13 }
  0x5e   : > { %s3579_s25 = scalar_lea.vmem %s422_s13, 512  ;;  %p4741_p12 = pneg %p4740_p6 }
  0x5f   : > { %p3580_p1 = scmp.ne.s32.totalorder %s422_s13, %s3579_s25  ;;  %p3587_p3 = scmp.lt.s32.totalorder %s422_s13, %s422_s13 }
  0x60   : > { %p3588_p7 = scmp.lt.s32.totalorder %s3579_s25, %s3579_s25 }
  0x61   : > { %p3582_p10 = pnand %p3580_p1, %p4741_p12 }
  0x62   : > { %p3589_p2 = por %p3588_p7, %p3587_p3 }
  0x63   : > { %p3583_p5 = pneg %p3582_p10 }
  0x65   : > { %p3590_p4 = pnand %p3589_p2, %p3583_p5 }
  0x67   : > { %3593 = shalt.err (!%p3590_p4)
}
  0x68   : > { %s4742_s6 = smov 8   ;;  %s4743_s10 = smov 128  }
  0x69   : > { %3369 = dma.hbm_to_vmem [thread:$0]  (!%p4740_p6), %s4690_s9, 512, %s422_s13, [#allocation12], %s4743_s10, %s4743_s10, %s4742_s6  }
  0x6a   : > { %s4744_s0 = sld [smem:[#allocation30_spill]]  ;;  %s442_s19 = scalar_lea.vmem [#allocation2], %s4011_s21 }
  0x6b   : > { %s449_s8 = sshll.u32 %s442_s19, 4  ;;  %s4745_s22 = sand.u32 1, %s3810_s27   ;;  %s450_s8 = int_to_ptr.vmem [resolvable:$true] %s449_s8 }
  0x6c   : > { %s439_s12 = scalar_lea.sflag [#allocation3], %s4745_s22 }
  0x70   : > { %s4070_s7 = scalar_lea.hbm %s4744_s0, %s4014_s23  ;;  %s3599_s6 = scalar_lea.hbm %s4744_s0, 256 }
  0x71   : > { %s3594_s25 = scalar_lea.hbm %s4070_s7, 128  ;;  %p3600_p1 = scmp.lt.s32.totalorder %s4070_s7, %s4744_s0 }
  0x72   : > { %p3595_p8 = scmp.ne.s32.totalorder %s4070_s7, %s3594_s25  ;;  %p3601_p6 = scmp.lt.s32.totalorder %s3599_s6, %s3594_s25 }
  0x74   : > { %p3597_p11 = pnand %p3595_p8, %p4036_p13  ;;  %p3602_p12 = por %p3601_p6, %p3600_p1 }
  0x76   : > { %p3598_p0 = pneg %p3597_p11 }
  0x78   : > { %p3603_p10 = pnand %p3602_p12, %p3598_p0 }
  0x7a   : > { %3606 = shalt.err (!%p3603_p10)
}
  0x7b   : > { %s3607_s20 = scalar_lea.vmem %s450_s8, 128  ;;  %s3822_s18 = smov [#allocation2]  }
  0x7c   : > { %p3608_p5 = scmp.ne.s32.totalorder %s450_s8, %s3607_s20  ;;  %s3612_s19 = sshll.u32 %s3822_s18, 4  ;;  %s3613_s19 = int_to_ptr.vmem [resolvable:$false] %s3612_s19 }
  0x7d   : > { %s3614_s22 = scalar_lea.vmem %s3613_s19, 256  ;;  %p3615_p2 = scmp.lt.s32.totalorder %s450_s8, %s3613_s19 }
  0x7e   : > { %p3610_p3 = pnand %p3608_p5, %p4036_p13  ;;  %p3616_p4 = scmp.lt.s32.totalorder %s3614_s22, %s3607_s20 }
  0x80   : > { %p3611_p7 = pneg %p3610_p3  ;;  %p3617_p8 = por %p3616_p4, %p3615_p2 }
  0x82   : > { %p3618_p11 = pnand %p3617_p8, %p3611_p7 }
  0x84   : > { %3621 = shalt.err (!%p3618_p11)
}
  0x85   : > { %3373 = dma.hbm_to_vmem [thread:$0]  (!%p4016_p9), %s4070_s7, 128, %s450_s8, %s439_s12  }
  0x86   : > { %s483_s13 = scalar_lea.hbm %s4683_s2, %s4014_s23  ;;  %s478_s6 = scalar_lea.vmem [#allocation7], %s4011_s21 }
  0x87   : > { %s485_s10 = sshll.u32 %s478_s6, 4  ;;  %s3622_s15 = scalar_lea.hbm %s483_s13, 128  ;;  %s486_s10 = int_to_ptr.vmem [resolvable:$true] %s485_s10 }
  0x88   : > { %p3623_p0 = scmp.ne.s32.totalorder %s483_s13, %s3622_s15  ;;  %s3627_s19 = scalar_lea.hbm %s4683_s2, 256 }
  0x89   : > { %p3628_p12 = scmp.lt.s32.totalorder %s483_s13, %s4683_s2  ;;  %p3629_p10 = scmp.lt.s32.totalorder %s3627_s19, %s3622_s15 }
  0x8a   : > { %p3625_p1 = pnand %p3623_p0, %p4036_p13 }
  0x8b   : > { %p3630_p5 = por %p3629_p10, %p3628_p12 }
  0x8c   : > { %p3626_p6 = pneg %p3625_p1 }
  0x8e   : > { %p3631_p3 = pnand %p3630_p5, %p3626_p6 }
  0x90   : > { %3634 = shalt.err (!%p3631_p3)
}
  0x91   : > { %s3635_s7 = scalar_lea.vmem %s486_s10, 128  ;;  %s3823_s8 = smov [#allocation7]  }
  0x92   : > { %p3636_p7 = scmp.ne.s32.totalorder %s486_s10, %s3635_s7  ;;  %s3640_s12 = sshll.u32 %s3823_s8, 4  ;;  %s3641_s12 = int_to_ptr.vmem [resolvable:$false] %s3640_s12 }
  0x93   : > { %s3642_s25 = scalar_lea.vmem %s3641_s12, 256  ;;  %p3643_p8 = scmp.lt.s32.totalorder %s486_s10, %s3641_s12 }
  0x94   : > { %p3638_p2 = pnand %p3636_p7, %p4036_p13  ;;  %p3644_p11 = scmp.lt.s32.totalorder %s3642_s25, %s3635_s7 }
  0x96   : > { %p3639_p4 = pneg %p3638_p2  ;;  %p3645_p0 = por %p3644_p11, %p3643_p8 }
  0x98   : > { %p3646_p1 = pnand %p3645_p0, %p3639_p4 }
  0x9a   : > { %3649 = shalt.err (!%p3646_p1)
}
  0x9b   : > { %3379 = dma.hbm_to_vmem [thread:$0]  (!%p4016_p9), %s483_s13, 128, %s486_s10, %s4030_s30  }
  0x9c   : > { %s4113_s6 = scalar_lea.hbm %s4684_s3, %s4014_s23  ;;  %s496_s15 = scalar_lea.vmem [#allocation8], %s4011_s21 }
  0x9d   : > { %s503_s20 = sshll.u32 %s496_s15, 4  ;;  %s4746_s18 = sand.u32 1, %s3814_s28   ;;  %s504_s20 = int_to_ptr.vmem [resolvable:$true] %s503_s20 }
  0x9e   : > { %s493_s19 = scalar_lea.sflag [#allocation9], %s4746_s18  ;;  %s3650_s22 = scalar_lea.hbm %s4113_s6, 128 }
  0x9f   : > { %p3651_p6 = scmp.ne.s32.totalorder %s4113_s6, %s3650_s22  ;;  %s3655_s13 = scalar_lea.hbm %s4684_s3, 256 }
  0xa0   : > { %p3656_p5 = scmp.lt.s32.totalorder %s4113_s6, %s4684_s3  ;;  %p3657_p3 = scmp.lt.s32.totalorder %s3655_s13, %s3650_s22 }
  0xa1   : > { %p3653_p12 = pnand %p3651_p6, %p4036_p13 }
  0xa2   : > { %p3658_p7 = por %p3657_p3, %p3656_p5 }
  0xa3   : > { %p3654_p10 = pneg %p3653_p12 }
  0xa5   : > { %p3659_p2 = pnand %p3658_p7, %p3654_p10 }
  0xa7   : > { %3662 = shalt.err (!%p3659_p2)
}
  0xa8   : > { %s3663_s21 = scalar_lea.vmem %s504_s20, 128  ;;  %s3824_s8 = smov [#allocation8]  }
  0xa9   : > { %p3664_p4 = scmp.ne.s32.totalorder %s504_s20, %s3663_s21  ;;  %s3668_s12 = sshll.u32 %s3824_s8, 4  ;;  %s3669_s12 = int_to_ptr.vmem [resolvable:$false] %s3668_s12 }
  0xaa   : > { %s3670_s25 = scalar_lea.vmem %s3669_s12, 256  ;;  %p3671_p0 = scmp.lt.s32.totalorder %s504_s20, %s3669_s12 }
  0xab   : > { %p3666_p8 = pnand %p3664_p4, %p4036_p13  ;;  %p3672_p1 = scmp.lt.s32.totalorder %s3670_s25, %s3663_s21 }
  0xad   : > { %p3667_p11 = pneg %p3666_p8  ;;  %p3673_p6 = por %p3672_p1, %p3671_p0 }
  0xaf   : > { %p3674_p12 = pnand %p3673_p6, %p3667_p11 }
  0xb1   : > { %3677 = shalt.err (!%p3674_p12)
}
  0xb2   : > { %3382 = dma.hbm_to_vmem [thread:$0]  (!%p4016_p9), %s4113_s6, 128, %s504_s20, %s493_s19  }
  0xb3   : > { %p4747_p10 = scmp.ne.s32.totalorder %s4730_s16, 0 }
  0xb4   : > { %s4137_s11 = sand.u32 (!%p4747_p10), 1, %s3806_s26   ;;  %p4748_p13 = scmp.ne.s32.totalorder (!%p4747_p10), %s4727_s14, 0 }
  0xb5   : > { %512 = sbr.rel (%p4747_p10) target bundleno = 4453 (0x1165), region = 64  ;;  %s4140_s0 = sshll.u32 (!%p4747_p10), %s4137_s11, 3 }
  0xb6   : > { %s515_s24 = scalar_lea.sflag (!%p4747_p10), [#allocation3], %s4137_s11  ;;  %s518_s15 = scalar_lea.vmem (!%p4747_p10), [#allocation2], %s4140_s0 }
  0xba   : > { %3773 = dma.done.wait (%p4748_p13), %s515_s24, 128  }
  0xbb   : > { %3775 = vsyncadd (%p4748_p13), %s515_s24, 4294967168  ;;  %s4149_s16 = sand.u32 1, %s3931_s29   ;;  %s527_s6 = scalar_lea.vmem [#allocation5], %s4140_s0 }
  0xbc   : > { %s524_s17 = scalar_lea.sflag [#allocation6], %s4149_s16 }
  0xbd   : > { %3777 = dma.done.wait (%p4748_p13), %s524_s17, 256  }
  0xbe   : > { %3779 = vsyncadd (%p4748_p13), %s524_s17, 4294967040  ;;  %s536_s20 = scalar_lea.vmem [#allocation7], %s4140_s0  ;;  %s542_s18 = scalar_lea.sflag [#allocation9], %s4149_s16 }
  0xbf   : > { %s545_s19 = scalar_lea.vmem [#allocation8], %s4140_s0 }
  0xc0   : > { %3781 = dma.done.wait (%p4748_p13), %s542_s18, 128  }
  0xc1   : > { %3783 = vsyncadd (%p4748_p13), %s542_s18, 4294967168  ;;  %p4749_p9 = scmp.eq.s32.totalorder %s3931_s29, 0 }
  0xc3   : > { %3785 = dma.done.wait (%p4749_p9), [#allocation9], 512   ;;  %p4750_p5 = pmov %p4749_p9 }
  0xc5   : > { %3787 = vsyncadd (%p4750_p5), [#allocation9], 4294966784  ;;  %p4751_p3 = pmov %p4750_p5 }
  0xc7   : > { %3789 = dma.done.wait (%p4751_p3), [#allocation12], 1024   ;;  %p4752_p7 = pmov %p4751_p3 }
  0xc8   : > { %v3825_v0 = vmov 0.0   ;;  %vm3826_vm0 = vmmov 0   ;;  %v630_v1 = vld [vmem:[%s4685_s4 + $0x18] sm:$0xff]  ;;  %v629_v2 = vld [vmem:[%s4685_s4 + $0x10] sm:$0xff]  ;;  %v628_v3 = vld [vmem:[%s4685_s4 + $0x8] sm:$0xff]  ;;  %vm631_vm1 = vcmask 261120  }
  0xc9   : > { %3791 = vsyncadd (%p4752_p7), [#allocation12], 4294966272  ;;  %3169 = vmatprep.subr.mxu1 %v3825_v0  ;;  %3177 = vmatprep.mubr.msk.f32.mxu1 %vm3826_vm0, %v3825_v0  ;;  %v627_v4 = vld [vmem:[%s4685_s4] sm:$0xff]  ;;  %s3827_s8 = smov 104   ;;  %s3828_s12 = smov 120   ;;  %vm719_vm2 = vcmask 64512  }
  0xca   : > { %3190 = vmatprep.subr.mxu0 %v3825_v0  ;;  %3192 = vmatprep.mubr.msk.f32.mxu0 %vm3826_vm0, %v3825_v0  ;;  %v4194_v5 = vld [vmem:[%s518_s15] sm:$0xff]  ;;  %s3829_s25 = smov 96   ;;  %s3830_s24 = smov 112   ;;  %vm1383_vm3 = vcmask 130048   ;;  %vm1385_vm4 = vcmask 195584   ;;  %vm1514_vm5 = vcmask 523264  }
  0xcb   : > { %3170 = vmatpush3.msra.mxu1 %v630_v1  ;;  %v705_v15 = vld [vmem:[%s536_s20] sm:$0xff]  ;;  %s3831_s15 = smov 64   ;;  %s3832_s10 = smov 8   ;;  %vm1516_vm6 = vcmask 785408  }
  0xcc   : > { %3171 = vmatprep.subr.mxu1 %v3825_v0  ;;  %s3833_s23 = smov 24   ;;  %s3834_s21 = smov 16  }
  0xcd   : > { %3172 = vmatpush3.msra.mxu1 %v629_v2  ;;  %s4753_s18 = sld [smem:[#allocation31_spill]]  ;;  %s2756_s7 = scalar_lea.sflag [#allocation16], %s4149_s16 }
  0xce   : > { %3173 = vmatprep.subr.mxu1 %v3825_v0  ;;  %s4757_s17 = sld [smem:[#allocation28_spill]] }
  0xcf   : > { %3174 = vmatpush3.msra.mxu1 %v628_v3  ;;  %s4758_s14 = sld [smem:[#allocation36_spill]] }
  0xd0   : > { %3175 = vmatprep.subr.mxu1 %v3825_v0 }
  0xd1   : > { %3176 = vmatpush3.msra.mxu1 %v627_v4 }
  0xd2   : > { %3178 = vmatmul.mubr.msk.f32.vlgmr.msra.gmra.mxu1 %vm631_vm1, %v4194_v5  ;;  %3180 = vmatprep.subr.mxu1 %v3825_v0 }
  0xd3   : > { %3182 = vmatprep.mubr.msk.f32.mxu1 %vm3826_vm0, %v3825_v0 }
  0xd4   : > { %p4759_p4 = scmp.ne.s32.totalorder %s4757_s17, 0 }
 0x192   : > { %v701_v6 = vpop.f32.mrf.mxu1 }
 0x193   : > { %715 = vrot.lane.b32.xlu1 %v701_v6, %s3827_s8  ;;  %711 = vrot.lane.b32.xlu0 %v701_v6, %s3828_s12 }
 0x194   : > { %v3179_v7 = vpop.f32.mrf.mxu1 }
 0x197   : > { %717 = vrot.lane.b32.xlu1 %v701_v6, %s3829_s25  ;;  %713 = vrot.lane.b32.xlu0 %v701_v6, %s3830_s24 }
 0x205   : > { %v4206_v8 = vpop.permute.xlu1 %715  ;;  %v712_v9 = vpop.permute.xlu0 %711 }
 0x206   : > { %794 = vrot.lane.b32.xlu0 %v712_v9, %s3829_s25 }
 0x209   : > { %v718_v10 = vpop.permute.xlu1 %717  ;;  %v4209_v11 = vpop.permute.xlu0 %713 }
 0x20a   : > { %3181 = vmatpush3.xpose.msk.msra.mxu1 %vm719_vm2, %v718_v10  ;;  %946 = vrot.lane.b32.xlu0 %v4206_v8, %s3829_s25  ;;  %v707_v10 = vld [vmem:[%s4686_s5 + $0x8] sm:$0xff] }
 0x20b   : > { %870 = vrot.lane.b32.xlu1 %v4209_v11, %s3829_s25  ;;  %3185 = vmatprep.subr.mxu1 %v3825_v0 }
 0x20d   : > { %3183 = vmatmul.mubr.msk.f32.vlgmr.msra.gmra.mxu1 %vm719_vm2, %v701_v6 }
 0x20e   : > { %3187 = vmatprep.mubr.msk.f32.mxu1 %vm3826_vm0, %v3825_v0 }
 0x278   : > { %v795_v12 = vpop.permute.xlu0 %794 }
 0x279   : > { %3186 = vmatpush3.xpose.msk.msra.mxu1 %vm719_vm2, %v795_v12 }
 0x27a   : > { %3195 = vmatprep.subr.mxu1 %v3825_v0 }
 0x27c   : > { %3188 = vmatmul.mubr.msk.f32.vlgmr.msra.gmra.mxu1 %vm719_vm2, %v712_v9  ;;  %v947_v13 = vpop.permute.xlu0 %946 }
 0x27d   : > { %v871_v14 = vpop.permute.xlu1 %870  ;;  %3196 = vmatpush3.xpose.msk.msra.mxu1 %vm719_vm2, %v947_v13  ;;  %3197 = vmatprep.mubr.msk.f32.mxu1 %vm3826_vm0, %v3825_v0 }
 0x27e   : > { %3191 = vmatpush3.xpose.msk.msra.mxu0 %vm719_vm2, %v871_v14  ;;  %3205 = vmatprep.subr.mxu1 %v3825_v0 }
 0x27f   : > { %3200 = vmatprep.subr.mxu0 %v3825_v0 }
 0x280   : > { %3198 = vmatmul.mubr.msk.f32.vlgmr.msra.gmra.mxu1 %vm719_vm2, %v4206_v8 }
 0x281   : > { %3193 = vmatmul.mubr.msk.f32.vlgmr.msra.gmra.mxu0 %vm719_vm2, %v4209_v11  ;;  %3207 = vmatprep.mubr.msk.f32.mxu1 %vm3826_vm0, %v3825_v0 }
 0x282   : > { %3202 = vmatprep.mubr.msk.f32.mxu0 %vm3826_vm0, %v3825_v0 }
 0x2cd   : > { %v790_v16 = vpop.f32.mrf.mxu1 }
 0x2ce   : > { %v791_v17 = vadd.f32 %v790_v16, %v705_v15 }
 0x2cf   : > { %v3184_v18 = vpop.f32.mrf.mxu1 }
 0x2d0   : > { %v1022_v19 = vsel %vm719_vm2, %v791_v17, -inf }
 0x2d1   : > { %1023 = vmax.xlane.f32.xlu1 %v1022_v19 }
 0x33c   : > { %v866_v20 = vpop.f32.mrf.mxu1 }
 0x33d   : > { %v867_v21 = vadd.f32 %v866_v20, %v705_v15 }
 0x33e   : > { %v3189_v22 = vpop.f32.mrf.mxu1 }
 0x33f   : > { %v1025_v23 = vsel %vm719_vm2, %v867_v21, -inf }
 0x340   : > { %1026 = vmax.xlane.f32.xlu0 %v1025_v23  ;;  %v1018_v24 = vpop.f32.mrf.mxu1 }
 0x341   : > { %v942_v25 = vpop.f32.mrf.mxu0  ;;  %v1019_v26 = vadd.f32 %v1018_v24, %v705_v15 }
 0x342   : > { %v943_v27 = vadd.f32 %v942_v25, %v705_v15  ;;  %v3199_v28 = vpop.f32.mrf.mxu1 }
 0x343   : > { %v3194_v29 = vpop.f32.mrf.mxu0  ;;  %v1031_v30 = vsel %vm719_vm2, %v1019_v26, -inf }
 0x344   : > { %v1028_v31 = vsel %vm719_vm2, %v943_v27, -inf  ;;  %1032 = vmax.xlane.f32.xlu1 %v1031_v30 }
 0x345   : > { %1029 = vmax.xlane.f32.xlu0 %v1028_v31 }
 0x355   : > { %1142 = vrot.lane.b32.xlu1 %v712_v9, %s3831_s15  ;;  %v708_v9 = vld [vmem:[%s4686_s5 + $0x10] sm:$0xff] }
 0x35a   : > { %v1024_v32 = vpop.xlane.xlu1 %1023 }
 0x35b   : > { %1066 = vrot.lane.b32.xlu0 %v701_v6, %s3831_s15  ;;  %v1034_v33 = vsub.f32 %v791_v17, %v1024_v32  ;;  %v709_v6 = vld [vmem:[%s4686_s5 + $0x18] sm:$0xff] }
 0x35d   : > { %v1038_v34 = vmul.f32 1.442695, %v1034_v33  ;;  %v1624_v33 = vld [vmem:[#allocation10 + $0x18] sm:$0xff] }
 0x35f   : > { %3450 = vpow2.f32 %v1038_v34  ;;  %v1623_v34 = vld [vmem:[#allocation10 + $0x10] sm:$0xff] }
 0x36c   : > { %v3451_v35 = vpop.eup %3450 }
 0x36d   : > { %v1046_v36 = vsel %vm719_vm2, %v3451_v35, 0.0 }
 0x37a   : > { %1047 = vadd.xlane.f32.xlu0 %v1046_v36  ;;  %v626_v36 = vld [vmem:[%s527_s6] sm:$0xff]  ;;  %s3837_s6 = smov [#allocation15]  }
 0x37b   : > { %s3682_s13 = sshll.u32 %s3837_s6, 4  ;;  %s3683_s13 = int_to_ptr.vmem [resolvable:$false] %s3682_s13 }
 0x37c   : > { %s3684_s0 = scalar_lea.vmem %s3683_s13, 64 }
 0x3c9   : > { %v1027_v37 = vpop.xlane.xlu0 %1026 }
 0x3ca   : > { %v1035_v38 = vsub.f32 %v867_v21, %v1027_v37  ;;  %v1547_v37 = vld [vmem:[%s4753_s18 + $0x18] sm:$0xff] }
 0x3cc   : > { %v1040_v39 = vmul.f32 1.442695, %v1035_v38  ;;  %v1546_v38 = vld [vmem:[%s4753_s18 + $0x10] sm:$0xff] }
 0x3cd   : > { %v1033_v40 = vpop.xlane.xlu1 %1032 }
 0x3ce   : > { %3452 = vpow2.f32 %v1040_v39  ;;  %v1030_v41 = vpop.xlane.xlu0 %1029  ;;  %v1037_v42 = vsub.f32 %v1019_v26, %v1033_v40  ;;  %v1545_v39 = vld [vmem:[%s4753_s18 + $0x8] sm:$0xff]  ;;  %v1544_v40 = vld [vmem:[%s4753_s18] sm:$0xff] }
 0x3cf   : > { %v1036_v43 = vsub.f32 %v943_v27, %v1030_v41 }
 0x3d0   : > { %v1044_v44 = vmul.f32 1.442695, %v1037_v42 }
 0x3d1   : > { %v1042_v45 = vmul.f32 1.442695, %v1036_v43  ;;  %v1143_v46 = vpop.permute.xlu1 %1142 }
 0x3d2   : > { %3454 = vpow2.f32 %v1044_v44  ;;  %v1067_v47 = vpop.permute.xlu0 %1066  ;;  %3206 = vmatpush3.msra.mxu1 %v1143_v46 }
 0x3d3   : > { %3456 = vpow2.f32 %v1042_v45  ;;  %3201 = vmatpush3.msra.mxu0 %v1067_v47  ;;  %3215 = vmatprep.subr.mxu1 %v3825_v0 }
 0x3d4   : > { %3210 = vmatprep.subr.mxu0 %v3825_v0 }
 0x3db   : > { %v3453_v48 = vpop.eup %3452 }
 0x3dc   : > { %v1049_v49 = vsel %vm719_vm2, %v3453_v48, 0.0 }
 0x3dd   : > { %1050 = vadd.xlane.f32.xlu1 %v1049_v49 }
 0x3df   : > { %v3455_v50 = vpop.eup %3454 }
 0x3e0   : > { %v3457_v51 = vpop.eup %3456  ;;  %v1055_v52 = vsel %vm719_vm2, %v3455_v50, 0.0 }
 0x3e1   : > { %v1052_v53 = vsel %vm719_vm2, %v3457_v51, 0.0  ;;  %1056 = vadd.xlane.f32.xlu1 %v1055_v52 }
 0x3e2   : > { %1053 = vadd.xlane.f32.xlu0 %v1052_v53 }
 0x3f2   : > { %1218 = vrot.lane.b32.xlu1 %v4209_v11, %s3831_s15  ;;  %v706_v11 = vld [vmem:[%s4686_s5] sm:$0xff] }
 0x3f8   : > { %1294 = vrot.lane.b32.xlu0 %v4206_v8, %s3831_s15 }
 0x403   : > { %v1048_v54 = vpop.xlane.xlu0 %1047 }
 0x404   : > { %3458 = vrcp.f32 %v1048_v54 }
 0x411   : > { %v3459_v55 = vpop.eup %3458 }
 0x412   : > { %v4255_v56 = vmul.f32 %v3459_v55, %v3451_v35  ;;  %v1621_v35 = vld [vmem:[#allocation10] sm:$0xff] }
 0x414   : > { %3203 = vmatmul.mubr.msk.f32.vlgmr.msra.gmra.mxu0 %vm719_vm2, %v4255_v56 }
 0x415   : > { %3212 = vmatprep.mubr.msk.f32.mxu0 %vm3826_vm0, %v3825_v0 }
 0x466   : > { %v1051_v57 = vpop.xlane.xlu1 %1050 }
 0x467   : > { %3460 = vrcp.f32 %v1051_v57  ;;  %v1698_v57 = vld [vmem:[%s545_s19] sm:$0xff] }
 0x46a   : > { %v1057_v58 = vpop.xlane.xlu1 %1056 }
 0x46b   : > { %v1054_v59 = vpop.xlane.xlu0 %1053  ;;  %3462 = vrcp.f32 %v1057_v58 }
 0x46c   : > { %3464 = vrcp.f32 %v1054_v59 }
 0x46e   : > { %v1219_v60 = vpop.permute.xlu1 %1218 }
 0x46f   : > { %3211 = vmatpush3.msra.mxu0 %v1219_v60  ;;  %v1295_v63 = vpop.permute.xlu0 %1294 }
 0x470   : > { %3220 = vmatprep.subr.mxu0 %v3825_v0 }
 0x474   : > { %v3461_v61 = vpop.eup %3460 }
 0x475   : > { %v4262_v62 = vmul.f32 %v3461_v61, %v3453_v48 }
 0x477   : > { %3208 = vmatmul.mubr.msk.f32.vlgmr.msra.gmra.mxu1 %vm719_vm2, %v4262_v62 }
 0x478   : > { %v3463_v1 = vpop.eup %3462  ;;  %3216 = vmatpush3.msra.mxu1 %v1295_v63  ;;  %3217 = vmatprep.mubr.msk.f32.mxu1 %vm3826_vm0, %v3825_v0 }
 0x479   : > { %v3465_v2 = vpop.eup %3464  ;;  %v4268_v3 = vmul.f32 %v3463_v1, %v3455_v50  ;;  %3231 = vmatprep.subr.mxu1 %v3825_v0 }
 0x47a   : > { %v4271_v4 = vmul.f32 %v3465_v2, %v3457_v51 }
 0x47b   : > { %3218 = vmatmul.mubr.msk.f32.vlgmr.msra.gmra.mxu1 %vm719_vm2, %v4268_v3 }
 0x47c   : > { %3213 = vmatmul.mubr.msk.f32.vlgmr.msra.gmra.mxu0 %vm719_vm2, %v4271_v4  ;;  %3239 = vmatprep.mubr.msk.f32.mxu1 %vm3826_vm0, %v3825_v0 }
 0x47d   : > { %3228 = vmatprep.mubr.msk.f32.mxu0 %vm3826_vm0, %v3825_v0  ;;  %3221 = vmatpush3.msra.mxu0 %v709_v6 }
 0x47e   : > { %3222 = vmatprep.subr.mxu0 %v3825_v0  ;;  %3232 = vmatpush3.msra.mxu1 %v1547_v37 }
 0x47f   : > { %3223 = vmatpush3.msra.mxu0 %v708_v9  ;;  %3233 = vmatprep.subr.mxu1 %v3825_v0 }
 0x480   : > { %3224 = vmatprep.subr.mxu0 %v3825_v0  ;;  %3234 = vmatpush3.msra.mxu1 %v1546_v38 }
 0x481   : > { %3225 = vmatpush3.msra.mxu0 %v707_v10  ;;  %3235 = vmatprep.subr.mxu1 %v3825_v0 }
 0x482   : > { %3226 = vmatprep.subr.mxu0 %v3825_v0  ;;  %3236 = vmatpush3.msra.mxu1 %v1545_v39 }
 0x483   : > { %3227 = vmatpush3.msra.mxu0 %v706_v11  ;;  %3237 = vmatprep.subr.mxu1 %v3825_v0 }
 0x484   : > { %3242 = vmatprep.subr.mxu0 %v3825_v0  ;;  %3238 = vmatpush3.msra.mxu1 %v1544_v40 }
 0x485   : > { %3253 = vmatprep.subr.mxu1 %v3825_v0 }
 0x4d4   : > { %v1138_v7 = vpop.f32.mrf.mxu0 }
 0x4d6   : > { %v3204_v8 = vpop.f32.mrf.mxu0 }
 0x537   : > { %v1214_v12 = vpop.f32.mrf.mxu1 }
 0x538   : > { %1371 = vrot.lane.b32.xlu1 %v1214_v12, %s3832_s10 }
 0x539   : > { %v3209_v13 = vpop.f32.mrf.mxu1 }
 0x53b   : > { %v1366_v14 = vpop.f32.mrf.mxu1 }
 0x53c   : > { %v1290_v15 = vpop.f32.mrf.mxu0  ;;  %1379 = vrot.lane.b32.xlu1 %v1366_v14, %s3833_s23 }
 0x53d   : > { %1375 = vrot.lane.b32.xlu0 %v1290_v15, %s3834_s21  ;;  %v3219_v16 = vpop.f32.mrf.mxu1 }
 0x53e   : > { %v3214_v17 = vpop.f32.mrf.mxu0 }
 0x5aa   : > { %v1372_v18 = vpop.permute.xlu1 %1371 }
 0x5ab   : > { %v1382_v20 = vsel %vm719_vm2, %v1138_v7, %v1372_v18 }
 0x5ae   : > { %v1380_v19 = vpop.permute.xlu1 %1379 }
 0x5af   : > { %v1376_v21 = vpop.permute.xlu0 %1375 }
 0x5b0   : > { %v1384_v22 = vsel %vm1383_vm3, %v1382_v20, %v1376_v21 }
 0x5b1   : > { %v1386_v23 = vsel %vm1385_vm4, %v1384_v22, %v1380_v19 }
 0x5b2   : > { %3229 = vmatmul.mubr.msk.f32.vlgmr.msra.gmra.mxu0 %vm631_vm1, %v1386_v23 }
 0x5b3   : > { %3250 = vmatprep.mubr.msk.f32.mxu0 %vm3826_vm0, %v3825_v0  ;;  %3243 = vmatpush3.msra.mxu0 %v1624_v33 }
 0x5b4   : > { %3244 = vmatprep.subr.mxu0 %v3825_v0 }
 0x5b5   : > { %3245 = vmatpush3.msra.mxu0 %v1623_v34 }
 0x5b6   : > { %3246 = vmatprep.subr.mxu0 %v3825_v0 }
 0x672   : > { %v1456_v24 = vpop.f32.mrf.mxu0 }
 0x673   : > { %v1457_v25 = vadd.f32 %v1456_v24, %v4194_v5  ;;  %v1622_v5 = vld [vmem:[#allocation10 + $0x8] sm:$0xff] }
 0x674   : > { %v3230_v26 = vpop.f32.mrf.mxu0  ;;  %3247 = vmatpush3.msra.mxu0 %v1622_v5 }
 0x675   : > { %v1460_v27 = vsel %vm631_vm1, %v1457_v25, 0.0  ;;  %3248 = vmatprep.subr.mxu0 %v3825_v0 }
 0x676   : > { %1461 = vadd.xlane.f32.xlu0 %v1460_v27  ;;  %3249 = vmatpush3.msra.mxu0 %v1621_v35 }
 0x677   : > { %3251 = vmatmul.mubr.msk.f32.vlgmr.msra.gmra.mxu0 %vm631_vm1, %v626_v36  ;;  %3263 = vmatprep.subr.mxu0 %v3825_v0 }
 0x678   : > { %3265 = vmatprep.mubr.msk.f32.mxu0 %vm3826_vm0, %v3825_v0 }
 0x6ff   : > { %v1462_v28 = vpop.xlane.xlu0 %1461 }
 0x700   : > { %v1464_v29 = vmul.f32 0.03125, %v1462_v28 }
 0x702   : > { %v1465_v30 = vsub.f32 %v1457_v25, %v1464_v29 }
 0x704   : > { %v1466_v31 = vmul.f32 %v1465_v30, %v1465_v30 }
 0x706   : > { %v1467_v32 = vsel %vm631_vm1, %v1466_v31, 0.0 }
 0x707   : > { %1468 = vadd.xlane.f32.xlu1 %v1467_v32 }
 0x737   : > { %v1694_v46 = vpop.f32.mrf.mxu0 }
 0x738   : > { %1711 = vrot.lane.b32.xlu0 %v1694_v46, %s3828_s12  ;;  %1715 = vrot.lane.b32.xlu1 %v1694_v46, %s3827_s8 }
 0x739   : > { %v3252_v47 = vpop.f32.mrf.mxu0 }
 0x73c   : > { %1713 = vrot.lane.b32.xlu0 %v1694_v46, %s3830_s24 }
 0x790   : > { %v1469_v41 = vpop.xlane.xlu1 %1468 }
 0x791   : > { %v1470_v42 = vmul.f32 0.03125, %v1469_v41 }
 0x793   : > { %v1471_v43 = vadd.f32 1e-05, %v1470_v42 }
 0x795   : > { %3466 = vrsqrt.f32 %v1471_v43 }
 0x7a2   : > { %v3467_v44 = vpop.eup %3466 }
 0x7a3   : > { %v4334_v45 = vmul.f32 %v3467_v44, %v1465_v30 }
 0x7a5   : > { %3240 = vmatmul.mubr.msk.f32.vlgmr.msra.gmra.mxu1 %vm631_vm1, %v4334_v45 }
 0x7a6   : > { %3255 = vmatprep.mubr.msk.f32.mxu1 %vm3826_vm0, %v3825_v0  ;;  %3254 = vmatpush3.xpose.msk.msra.mxu1 %vm719_vm2, %v1694_v46 }
 0x7a7   : > { %3258 = vmatprep.subr.mxu1 %v3825_v0 }
 0x7aa   : > { %v4345_v48 = vpop.permute.xlu0 %1711  ;;  %v4361_v52 = vpop.permute.xlu1 %1715 }
 0x7ae   : > { %v4347_v49 = vpop.permute.xlu0 %1713 }
 0x7af   : > { %3264 = vmatpush3.xpose.msk.msra.mxu0 %vm719_vm2, %v4347_v49 }
 0x7b0   : > { %3273 = vmatprep.subr.mxu0 %v3825_v0 }
 0x865   : > { %v1617_v50 = vpop.f32.mrf.mxu1 }
 0x866   : > { %1706 = vrot.lane.b32.xlu0 %v1617_v50, %s3830_s24  ;;  %1704 = vrot.lane.b32.xlu1 %v1617_v50, %s3828_s12 }
 0x867   : > { %3256 = vmatmul.mubr.msk.f32.vlgmr.msra.gmra.mxu1 %vm719_vm2, %v1617_v50  ;;  %v3241_v51 = vpop.f32.mrf.mxu1 }
 0x868   : > { %3259 = vmatpush3.xpose.msk.msra.mxu1 %vm719_vm2, %v4345_v48  ;;  %3260 = vmatprep.mubr.msk.f32.mxu1 %vm3826_vm0, %v3825_v0  ;;  %v1702_v51 = vld [vmem:[#allocation11 + $0x18] sm:$0xff] }
 0x869   : > { %3268 = vmatprep.subr.mxu1 %v3825_v0 }
 0x86a   : > { %1708 = vrot.lane.b32.xlu1 %v1617_v50, %s3827_s8  ;;  %s4754_s8 = sld [smem:[#allocation34_spill]] }
 0x8d8   : > { %v1707_v53 = vpop.permute.xlu0 %1706  ;;  %v1705_v54 = vpop.permute.xlu1 %1704 }
 0x8d9   : > { %3261 = vmatmul.mubr.msk.f32.vlgmr.msra.gmra.mxu1 %vm719_vm2, %v1705_v54  ;;  %3266 = vmatmul.mubr.msk.f32.vlgmr.msra.gmra.mxu0 %vm719_vm2, %v1707_v53  ;;  %v1701_v54 = vld [vmem:[#allocation11 + $0x10] sm:$0xff] }
 0x8da   : > { %3269 = vmatpush3.xpose.msk.msra.mxu1 %vm719_vm2, %v4361_v52  ;;  %3270 = vmatprep.mubr.msk.f32.mxu1 %vm3826_vm0, %v3825_v0 }
 0x8db   : > { %3275 = vmatprep.mubr.msk.f32.mxu0 %vm3826_vm0, %v3825_v0  ;;  %3278 = vmatprep.subr.mxu1 %v3825_v0 }
 0x8dc   : > { %v1709_v55 = vpop.permute.xlu1 %1708 }
 0x8dd   : > { %3271 = vmatmul.mubr.msk.f32.vlgmr.msra.gmra.mxu1 %vm719_vm2, %v1709_v55  ;;  %v1700_v55 = vld [vmem:[#allocation11 + $0x8] sm:$0xff] }
 0x8de   : > { %3280 = vmatprep.mubr.msk.f32.mxu1 %vm3826_vm0, %v3825_v0 }
 0x927   : > { %v1787_v58 = vpop.f32.mrf.mxu1 }
 0x928   : > { %v1788_v59 = vadd.f32 %v1787_v58, %v1698_v57 }
 0x929   : > { %v3257_v60 = vpop.f32.mrf.mxu1 }
 0x92a   : > { %v2013_v61 = vsel %vm719_vm2, %v1788_v59, -inf }
 0x92b   : > { %2014 = vmax.xlane.f32.xlu0 %v2013_v61 }
 0x999   : > { %v1861_v63 = vpop.f32.mrf.mxu1  ;;  %v1935_v1 = vpop.f32.mrf.mxu0 }
 0x99a   : > { %v1862_v2 = vadd.f32 %v1861_v63, %v1698_v57  ;;  %v1936_v6 = vadd.f32 %v1935_v1, %v1698_v57 }
 0x99b   : > { %v3262_v7 = vpop.f32.mrf.mxu1  ;;  %v3267_v8 = vpop.f32.mrf.mxu0 }
 0x99c   : > { %v2019_v9 = vsel %vm719_vm2, %v1936_v6, -inf  ;;  %v2016_v10 = vsel %vm719_vm2, %v1862_v2, -inf }
 0x99d   : > { %2020 = vmax.xlane.f32.xlu0 %v2019_v9  ;;  %2017 = vmax.xlane.f32.xlu1 %v2016_v10  ;;  %v2009_v11 = vpop.f32.mrf.mxu1 }
 0x99e   : > { %v2010_v12 = vadd.f32 %v2009_v11, %v1698_v57  ;;  %v1699_v57 = vld [vmem:[#allocation11] sm:$0xff] }
 0x99f   : > { %v3272_v13 = vpop.f32.mrf.mxu1 }
 0x9a0   : > { %v2022_v14 = vsel %vm719_vm2, %v2010_v12, -inf }
 0x9a1   : > { %2023 = vmax.xlane.f32.xlu0 %v2022_v14 }
 0x9ae   : > { %2057 = vrot.lane.b32.xlu1 %v1694_v46, %s3829_s25 }
 0x9b4   : > { %v2015_v15 = vpop.xlane.xlu0 %2014 }
 0x9b5   : > { %v2025_v16 = vsub.f32 %v1788_v59, %v2015_v15 }
 0x9b7   : > { %v2029_v17 = vmul.f32 1.442695, %v2025_v16 }
 0x9b9   : > { %3468 = vpow2.f32 %v2029_v17 }
 0x9c6   : > { %v3469_v18 = vpop.eup %3468 }
 0x9c7   : > { %v2037_v19 = vsel %vm719_vm2, %v3469_v18, 0.0 }
 0x9d2   : > { %2038 = vadd.xlane.f32.xlu1 %v2037_v19 }
 0xa26   : > { %v2021_v20 = vpop.xlane.xlu0 %2020  ;;  %v2018_v21 = vpop.xlane.xlu1 %2017 }
 0xa27   : > { %v2027_v22 = vsub.f32 %v1936_v6, %v2021_v20  ;;  %v2026_v23 = vsub.f32 %v1862_v2, %v2018_v21  ;;  %v2529_v20 = vld [vmem:[#allocation13 + $0x18] sm:$0xff]  ;;  %v2528_v21 = vld [vmem:[#allocation13 + $0x10] sm:$0xff] }
 0xa29   : > { %v2033_v24 = vmul.f32 1.442695, %v2027_v22  ;;  %v2031_v25 = vmul.f32 1.442695, %v2026_v23  ;;  %v2526_v22 = vld [vmem:[#allocation13] sm:$0xff]  ;;  %v2610_v23 = vld [vmem:[%s4754_s8 + $0x30] sm:$0xff] }
 0xa2a   : > { %v2058_v26 = vpop.permute.xlu1 %2057  ;;  %v2024_v27 = vpop.xlane.xlu0 %2023 }
 0xa2b   : > { %3470 = vpow2.f32 %v2033_v24  ;;  %v2028_v28 = vsub.f32 %v2010_v12, %v2024_v27  ;;  %3274 = vmatpush3.msra.mxu0 %v2058_v26  ;;  %v2609_v24 = vld [vmem:[%s4754_s8 + $0x28] sm:$0xff]  ;;  %v2607_v26 = vld [vmem:[%s4754_s8 + $0x18] sm:$0xff]  ;;  %v2606_v27 = vld [vmem:[%s4754_s8 + $0x10] sm:$0xff] }
 0xa2c   : > { %3472 = vpow2.f32 %v2031_v25  ;;  %3283 = vmatprep.subr.mxu0 %v3825_v0  ;;  %v2608_v25 = vld [vmem:[%s4754_s8 + $0x20] sm:$0xff] }
 0xa2d   : > { %v2035_v29 = vmul.f32 1.442695, %v2028_v28 }
 0xa2f   : > { %3474 = vpow2.f32 %v2035_v29 }
 0xa38   : > { %v3471_v30 = vpop.eup %3470 }
 0xa39   : > { %v3473_v31 = vpop.eup %3472  ;;  %v2043_v32 = vsel %vm719_vm2, %v3471_v30, 0.0 }
 0xa3a   : > { %2044 = vadd.xlane.f32.xlu1 %v2043_v32  ;;  %v2040_v33 = vsel %vm719_vm2, %v3473_v31, 0.0 }
 0xa3b   : > { %2041 = vadd.xlane.f32.xlu0 %v2040_v33  ;;  %v2605_v33 = vld [vmem:[%s4754_s8 + $0x8] sm:$0xff] }
 0xa3c   : > { %v3475_v34 = vpop.eup %3474 }
 0xa3d   : > { %v2046_v5 = vsel %vm719_vm2, %v3475_v34, 0.0 }
 0xa3f   : > { %2047 = vadd.xlane.f32.xlu0 %v2046_v5 }
 0xa4b   : > { %2209 = vrot.lane.b32.xlu1 %v4347_v49, %s3829_s25 }
 0xa4f   : > { %2285 = vrot.lane.b32.xlu1 %v4361_v52, %s3829_s25 }
 0xa55   : > { %2133 = vrot.lane.b32.xlu0 %v4345_v48, %s3829_s25 }
 0xa5b   : > { %v2039_v35 = vpop.xlane.xlu1 %2038 }
 0xa5c   : > { %3476 = vrcp.f32 %v2039_v35 }
 0xa69   : > { %v3477_v36 = vpop.eup %3476 }
 0xa6a   : > { %v4393_v37 = vmul.f32 %v3477_v36, %v3469_v18 }
 0xa6c   : > { %3276 = vmatmul.mubr.msk.f32.vlgmr.msra.gmra.mxu0 %vm719_vm2, %v4393_v37 }
 0xa6d   : > { %3285 = vmatprep.mubr.msk.f32.mxu0 %vm3826_vm0, %v3825_v0 }
 0xac3   : > { %v2045_v38 = vpop.xlane.xlu1 %2044 }
 0xac4   : > { %3478 = vrcp.f32 %v2045_v38  ;;  %v2042_v39 = vpop.xlane.xlu0 %2041 }
 0xac5   : > { %3480 = vrcp.f32 %v2042_v39 }
 0xac7   : > { %v2210_v40 = vpop.permute.xlu1 %2209 }
 0xac8   : > { %v2048_v41 = vpop.xlane.xlu0 %2047  ;;  %3284 = vmatpush3.msra.mxu0 %v2210_v40 }
 0xac9   : > { %3482 = vrcp.f32 %v2048_v41  ;;  %3293 = vmatprep.subr.mxu0 %v3825_v0 }
 0xacb   : > { %v2286_v48 = vpop.permute.xlu1 %2285 }
 0xacc   : > { %v2134_v42 = vpop.permute.xlu0 %2133 }
 0xacd   : > { %3279 = vmatpush3.msra.mxu1 %v2134_v42 }
 0xace   : > { %3288 = vmatprep.subr.mxu1 %v3825_v0 }
 0xad1   : > { %v3479_v43 = vpop.eup %3478 }
 0xad2   : > { %v3481_v44 = vpop.eup %3480  ;;  %v4401_v46 = vmul.f32 %v3479_v43, %v3471_v30 }
 0xad3   : > { %v2054_v47 = vmul.f32 %v3481_v44, %v3473_v31 }
 0xad4   : > { %3286 = vmatmul.mubr.msk.f32.vlgmr.msra.gmra.mxu0 %vm719_vm2, %v4401_v46 }
 0xad5   : > { %3281 = vmatmul.mubr.msk.f32.vlgmr.msra.gmra.mxu1 %vm719_vm2, %v2054_v47  ;;  %3301 = vmatprep.mubr.msk.f32.mxu0 %vm3826_vm0, %v3825_v0 }
 0xad6   : > { %v3483_v49 = vpop.eup %3482  ;;  %3289 = vmatpush3.msra.mxu1 %v2286_v48  ;;  %3290 = vmatprep.mubr.msk.f32.mxu1 %vm3826_vm0, %v3825_v0 }
 0xad7   : > { %v4410_v50 = vmul.f32 %v3483_v49, %v3475_v34  ;;  %3304 = vmatprep.subr.mxu1 %v3825_v0  ;;  %3294 = vmatpush3.msra.mxu0 %v1702_v51  ;;  %v2604_v34 = vld [vmem:[%s4754_s8] sm:$0xff] }
 0xad8   : > { %3295 = vmatprep.subr.mxu0 %v3825_v0 }
 0xad9   : > { %3291 = vmatmul.mubr.msk.f32.vlgmr.msra.gmra.mxu1 %vm719_vm2, %v4410_v50  ;;  %3296 = vmatpush3.msra.mxu0 %v1701_v54 }
 0xada   : > { %3312 = vmatprep.mubr.msk.f32.mxu1 %vm3826_vm0, %v3825_v0  ;;  %3297 = vmatprep.subr.mxu0 %v3825_v0 }
 0xadb   : > { %3298 = vmatpush3.msra.mxu0 %v1700_v55  ;;  %3305 = vmatpush3.msra.mxu1 %v2529_v20 }
 0xadc   : > { %3299 = vmatprep.subr.mxu0 %v3825_v0  ;;  %3306 = vmatprep.subr.mxu1 %v3825_v0 }
 0xadd   : > { %3300 = vmatpush3.msra.mxu0 %v1699_v57  ;;  %3307 = vmatpush3.msra.mxu1 %v2528_v21 }
 0xade   : > { %3315 = vmatprep.subr.mxu0 %v3825_v0  ;;  %3308 = vmatprep.subr.mxu1 %v3825_v0 }
 0xb2c   : > { %v2129_v52 = vpop.f32.mrf.mxu0 }
 0xb2e   : > { %v3277_v53 = vpop.f32.mrf.mxu0 }
 0xb94   : > { %v2281_v58 = vpop.f32.mrf.mxu0 }
 0xb95   : > { %v2205_v59 = vpop.f32.mrf.mxu1  ;;  %2366 = vrot.lane.b32.xlu1 %v2281_v58, %s3834_s21 }
 0xb96   : > { %2362 = vrot.lane.b32.xlu0 %v2205_v59, %s3832_s10  ;;  %v3287_v60 = vpop.f32.mrf.mxu0 }
 0xb97   : > { %v3282_v61 = vpop.f32.mrf.mxu1 }
 0xb99   : > { %v2357_v63 = vpop.f32.mrf.mxu1 }
 0xb9a   : > { %2370 = vrot.lane.b32.xlu0 %v2357_v63, %s3833_s23 }
 0xb9b   : > { %v3292_v1 = vpop.f32.mrf.mxu1 }
 0xc07   : > { %v2367_v6 = vpop.permute.xlu1 %2366 }
 0xc08   : > { %v2363_v2 = vpop.permute.xlu0 %2362 }
 0xc09   : > { %v2373_v7 = vsel %vm719_vm2, %v2129_v52, %v2363_v2 }
 0xc0a   : > { %v2374_v8 = vsel %vm1383_vm3, %v2373_v7, %v2367_v6 }
 0xc0c   : > { %v2371_v9 = vpop.permute.xlu0 %2370 }
 0xc0d   : > { %v2375_v10 = vsel %vm1385_vm4, %v2374_v8, %v2371_v9 }
 0xc0e   : > { %3302 = vmatmul.mubr.msk.f32.vlgmr.msra.gmra.mxu0 %vm631_vm1, %v2375_v10 }
 0xc0f   : > { %3331 = vmatprep.mubr.msk.f32.mxu0 %vm3826_vm0, %v3825_v0 }
 0xcce   : > { %v2445_v11 = vpop.f32.mrf.mxu0 }
 0xccf   : > { %v2446_v12 = vadd.f32 %v2445_v11, %v4334_v45  ;;  %v2527_v45 = vld [vmem:[#allocation13 + $0x8] sm:$0xff] }
 0xcd0   : > { %v3303_v13 = vpop.f32.mrf.mxu0  ;;  %3309 = vmatpush3.msra.mxu1 %v2527_v45 }
 0xcd1   : > { %v2449_v14 = vsel %vm631_vm1, %v2446_v12, 0.0  ;;  %3310 = vmatprep.subr.mxu1 %v3825_v0 }
 0xcd2   : > { %2450 = vadd.xlane.f32.xlu1 %v2449_v14  ;;  %3311 = vmatpush3.msra.mxu1 %v2526_v22 }
 0xce3   : > { %1477 = vrot.lane.b32.xlu1 %v4271_v4, %s3834_s21  ;;  %v2611_v4 = vld [vmem:[%s4754_s8 + $0x38] sm:$0xff] }
 0xce4   : > { %3316 = vmatpush3.msra.mxu0 %v2611_v4  ;;  %v3836_v4 = vmov 1966171168  }
 0xce5   : > { %3317 = vmatprep.subr.mxu0 %v3825_v0 }
 0xce6   : > { %3318 = vmatpush3.msra.mxu0 %v2610_v23  ;;  %v1525_v23 = vunpack.c.l.s4 %v3836_v4 }
 0xce7   : > { %2462 = vrot.lane.b32.xlu1 %v2054_v47, %s3832_s10  ;;  %3319 = vmatprep.subr.mxu0 %v3825_v0 }
 0xce8   : > { %3320 = vmatpush3.msra.mxu0 %v2609_v24  ;;  %v1527_v24 = vlaneseq }
 0xce9   : > { %3321 = vmatprep.subr.mxu0 %v3825_v0 }
 0xcea   : > { %3322 = vmatpush3.msra.mxu0 %v2608_v25  ;;  %vm4551_vm7 = vcmp.lt.s32.totalorder %v1527_v24, 256 }
 0xceb   : > { %3323 = vmatprep.subr.mxu0 %v3825_v0 }
 0xcec   : > { %3324 = vmatpush3.msra.mxu0 %v2607_v26 }
 0xced   : > { %3325 = vmatprep.subr.mxu0 %v3825_v0 }
 0xcee   : > { %3326 = vmatpush3.msra.mxu0 %v2606_v27  ;;  %v1526_v27 = vunpack.c.0.s8 %v1525_v23 }
 0xcef   : > { %3327 = vmatprep.subr.mxu0 %v3825_v0 }
 0xcf0   : > { %3328 = vmatpush3.msra.mxu0 %v2605_v33 }
 0xcf1   : > { %3329 = vmatprep.subr.mxu0 %v3825_v0 }
 0xcf2   : > { %3330 = vmatpush3.msra.mxu0 %v2604_v34 }
 0xd5b   : > { %v2451_v15 = vpop.xlane.xlu1 %2450 }
 0xd5c   : > { %v2452_v16 = vmul.f32 0.03125, %v2451_v15 }
 0xd5e   : > { %v2453_v17 = vsub.f32 %v2446_v12, %v2452_v16 }
 0xd5f   : > { %v1478_v49 = vpop.permute.xlu1 %1477 }
 0xd60   : > { %v2454_v18 = vmul.f32 %v2453_v17, %v2453_v17 }
 0xd62   : > { %v2455_v19 = vsel %vm631_vm1, %v2454_v18, 0.0 }
 0xd63   : > { %2456 = vadd.xlane.f32.xlu0 %v2455_v19  ;;  %v2463_v55 = vpop.permute.xlu1 %2462 }
 0xd64   : > { %v2471_v60 = vsel %vm719_vm2, %v4393_v37, %v2463_v55 }
 0xdec   : > { %v2457_v28 = vpop.xlane.xlu0 %2456 }
 0xded   : > { %v2458_v29 = vmul.f32 0.03125, %v2457_v28  ;;  %v1528_v28 = vshrl.u32 %v1527_v24, 7 }
 0xdef   : > { %v2459_v30 = vadd.f32 1e-05, %v2458_v29 }
 0xdf1   : > { %3484 = vrsqrt.f32 %v2459_v30 }
 0xdfe   : > { %v3485_v31 = vpop.eup %3484 }
 0xdff   : > { %v2461_v32 = vmul.f32 %v3485_v31, %v2453_v17 }
 0xe01   : > { %3313 = vmatmul.mubr.msk.f32.vlgmr.msra.gmra.mxu1 %vm631_vm1, %v2461_v32 }
 0xec1   : > { %v2599_v5 = vpop.f32.mrf.mxu1 }
 0xec2   : > { %v2603_v35 = vmax.f32 %v2599_v5, 0.0  ;;  %v4541_v5 = vsub.s32 %v1526_v27, %v1528_v28 }
 0xec3   : > { %v3314_v36 = vpop.f32.mrf.mxu1 }
 0xec4   : > { %3332 = vmatmul.mubr.msk.f32.vlgmr.msra.gmra.mxu0 %vm1514_vm5, %v2603_v35 }
 0xf84   : > { %v2681_v38 = vpop.f32.mrf.mxu0 }
 0xf85   : > { %v2682_v39 = vadd.f32 %v2681_v38, %v2461_v32 }
 0xf86   : > { %v3333_v40 = vpop.f32.mrf.mxu0 }
 0xf87   : > { %v2685_v41 = vsel %vm631_vm1, %v2682_v39, 0.0 }
 0xf88   : > { %2686 = vadd.xlane.f32.xlu0 %v2685_v41 }
 0xf9e   : > { %1474 = vrot.lane.b32.xlu0 %v4262_v62, %s3832_s10  ;;  %s3835_s10 = smov 32  }
 0xfa2   : > { %1480 = vrot.lane.b32.xlu0 %v4268_v3, %s3833_s23 }
 0xfa6   : > { %2468 = vrot.lane.b32.xlu0 %v4410_v50, %s3833_s23 }
0x1011   : > { %v2687_v0 = vpop.xlane.xlu0 %2686 }
0x1012   : > { %v2688_v42 = vmul.f32 0.03125, %v2687_v0 }
0x1014   : > { %v2689_v43 = vsub.f32 %v2682_v39, %v2688_v42 }
0x1015   : > { %v1475_v44 = vpop.permute.xlu0 %1474 }
0x1016   : > { %v1483_v47 = vsel %vm719_vm2, %v4255_v56, %v1475_v44  ;;  %v2690_v48 = vmul.f32 %v2689_v43, %v2689_v43 }
0x1017   : > { %v1484_v62 = vsel %vm1383_vm3, %v1483_v47, %v1478_v49 }
0x1018   : > { %v2691_v51 = vsel %vm631_vm1, %v2690_v48, 0.0 }
0x1019   : > { %2692 = vadd.xlane.f32.xlu1 %v2691_v51  ;;  %v1481_v52 = vpop.permute.xlu0 %1480 }
0x101a   : > { %v4484_v3 = vsel %vm1385_vm4, %v1484_v62, %v1481_v52 }
0x101b   : > { %v1501_v50 = vrot.slane %v4484_v3, 5  ;;  %v1505_v53 = vrot.slane %v4484_v3, 6  ;;  %v1487_v56 = vrot.slane %v4484_v3, 1  ;;  %v1491_v54 = vrot.slane %v4484_v3, 2 }
0x101c   : > { %v1509_v7 = vrot.slane %v4484_v3, 7  ;;  %v1495_v37 = vrot.slane %v4484_v3, 3  ;;  %v1499_v29 = vrot.slane %v4484_v3, 4 }
0x101d   : > { %1502 = vrot.lane.b32.xlu0 %v1501_v50, %s3835_s10  ;;  %v2469_v63 = vpop.permute.xlu0 %2468 }
0x1021   : > { %1506 = vrot.lane.b32.xlu0 %v1505_v53, %s3831_s15 }
0x102a   : > { %2465 = vrot.lane.b32.xlu1 %v4401_v46, %s3834_s21 }
0x102e   : > { %1488 = vrot.lane.b32.xlu1 %v1487_v56, %s3835_s10 }
0x1032   : > { %1492 = vrot.lane.b32.xlu1 %v1491_v54, %s3831_s15 }
0x108f   : > { %v1503_v20 = vpop.permute.xlu0 %1502 }
0x1090   : > { %v1518_v30 = vsel %vm631_vm1, %v1499_v29, %v1503_v20 }
0x1093   : > { %v1507_v45 = vpop.permute.xlu0 %1506 }
0x1094   : > { %v1519_v32 = vsel %vm1514_vm5, %v1518_v30, %v1507_v45 }
0x10a2   : > { %v2693_v57 = vpop.xlane.xlu1 %2692 }
0x10a3   : > { %v2694_v58 = vmul.f32 0.03125, %v2693_v57 }
0x10a5   : > { %v2695_v59 = vadd.f32 1e-05, %v2694_v58 }
0x10a6   : > { %v2466_v61 = vpop.permute.xlu1 %2465 }
0x10a7   : > { %3486 = vrsqrt.f32 %v2695_v59  ;;  %v2472_v46 = vsel %vm1383_vm3, %v2471_v60, %v2466_v61 }
0x10a8   : > { %v4500_v1 = vsel %vm1385_vm4, %v2472_v46, %v2469_v63 }
0x10a9   : > { %v2489_v2 = vrot.slane %v4500_v1, 5  ;;  %v2475_v6 = vrot.slane %v4500_v1, 1  ;;  %v2493_v8 = vrot.slane %v4500_v1, 6  ;;  %v2479_v9 = vrot.slane %v4500_v1, 2 }
0x10aa   : > { %v2497_v12 = vrot.slane %v4500_v1, 7  ;;  %v2483_v13 = vrot.slane %v4500_v1, 3  ;;  %v1489_v21 = vpop.permute.xlu1 %1488  ;;  %v2487_v42 = vrot.slane %v4500_v1, 4 }
0x10ab   : > { %2490 = vrot.lane.b32.xlu0 %v2489_v2, %s3835_s10  ;;  %2476 = vrot.lane.b32.xlu1 %v2475_v6, %s3835_s10  ;;  %v1513_v31 = vsel %vm631_vm1, %v4484_v3, %v1489_v21 }
0x10ae   : > { %v1493_v22 = vpop.permute.xlu1 %1492 }
0x10af   : > { %1510 = vrot.lane.b32.xlu0 %v1509_v7, %s3829_s25  ;;  %1496 = vrot.lane.b32.xlu1 %v1495_v37, %s3829_s25  ;;  %v1515_v33 = vsel %vm1514_vm5, %v1513_v31, %v1493_v22 }
0x10b3   : > { %2494 = vrot.lane.b32.xlu0 %v2493_v8, %s3831_s15  ;;  %2480 = vrot.lane.b32.xlu1 %v2479_v9, %s3831_s15 }
0x10b4   : > { %v3487_v10 = vpop.eup %3486 }
0x10b5   : > { %v4514_v11 = vmul.f32 %v3487_v10, %v2689_v43 }
0x10b7   : > { %2498 = vrot.lane.b32.xlu0 %v2497_v12, %s3829_s25  ;;  %2484 = vrot.lane.b32.xlu1 %v2483_v13, %s3829_s25  ;;  %v2713_v14 = vrot.slane %v4514_v11, 5  ;;  %v2699_v15 = vrot.slane %v4514_v11, 1  ;;  %v2717_v16 = vrot.slane %v4514_v11, 6  ;;  %v2703_v17 = vrot.slane %v4514_v11, 2 }
0x10b8   : > { %v2721_v18 = vrot.slane %v4514_v11, 7  ;;  %v2707_v19 = vrot.slane %v4514_v11, 3 }
0x10bb   : > { %2714 = vrot.lane.b32.xlu0 %v2713_v14, %s3835_s10  ;;  %2700 = vrot.lane.b32.xlu1 %v2699_v15, %s3835_s10 }
0x10bf   : > { %2718 = vrot.lane.b32.xlu0 %v2717_v16, %s3831_s15  ;;  %2704 = vrot.lane.b32.xlu1 %v2703_v17, %s3831_s15  ;;  %s4546_s15 = sshll.u32 %s3931_s29, 5 }
0x10c0   : > { %s4560_s22 = scalar_lea.hbm %s4758_s14, %s4546_s15 }
0x10c3   : > { %2722 = vrot.lane.b32.xlu0 %v2721_v18, %s3829_s25  ;;  %2708 = vrot.lane.b32.xlu1 %v2707_v19, %s3829_s25  ;;  %s4537_s25 = sshll.u32 %s4137_s11, 1 }
0x10c4   : > { %s617_s23 = scalar_lea.vmem [#allocation15], %s4537_s25 }
0x10c5   : > { %s2789_s21 = sshll.u32 %s617_s23, 4  ;;  %s4562_s21 = int_to_ptr.vmem [resolvable:$true] %s2789_s21 }
0x10c6   : > { %s3678_s30 = scalar_lea.vmem %s4562_s21, 32  ;;  %p3685_p0 = scmp.lt.s32.totalorder %s4562_s21, %s3683_s13 }
0x10c7   : > { %p3679_p2 = scmp.ne.s32.totalorder %s4562_s21, %s3678_s30  ;;  %p3686_p1 = scmp.lt.s32.totalorder %s3684_s0, %s3678_s30 }
0x10c9   : > { %p3680_p8 = pnand %p3679_p2, %p4759_p4  ;;  %p3687_p6 = por %p3686_p1, %p3685_p0 }
0x10cb   : > { %p3681_p11 = pneg %p3680_p8 }
0x10cd   : > { %p3688_p12 = pnand %p3687_p6, %p3681_p11 }
0x111d   : > { %v2477_v25 = vpop.permute.xlu1 %2476  ;;  %v2491_v26 = vpop.permute.xlu0 %2490 }
0x111e   : > { %v2501_v47 = vsel %vm631_vm1, %v4500_v1, %v2477_v25  ;;  %v2504_v48 = vsel %vm631_vm1, %v2487_v42, %v2491_v26 }
0x1121   : > { %v1497_v34 = vpop.permute.xlu1 %1496  ;;  %v1511_v35 = vpop.permute.xlu0 %1510 }
0x1122   : > { %v1517_v36 = vsel %vm1516_vm6, %v1515_v33, %v1497_v34  ;;  %v1520_v38 = vsel %vm1516_vm6, %v1519_v32, %v1511_v35 }
0x1123   : > { %v1523_v39 = vcombine.low %v1517_v36, %v1520_v38 }
0x1125   : > { %v1530_v40 = vrot.slane %v1523_v39, %v4541_v5  ;;  %v2481_v41 = vpop.permute.xlu1 %2480  ;;  %v2495_v0 = vpop.permute.xlu0 %2494 }
0x1126   : > { %v2502_v49 = vsel %vm1514_vm5, %v2501_v47, %v2481_v41  ;;  %v2505_v51 = vsel %vm1514_vm5, %v2504_v48, %v2495_v0 }
0x1127   : > { %v1537_v44 = vrot.slane %v1530_v40, %v4541_v5 }
0x1129   : > { %v2485_v62 = vpop.permute.xlu1 %2484  ;;  %v2499_v52 = vpop.permute.xlu0 %2498  ;;  %1543 = vst.msk [vmem:[%s617_s23] sm:$0x3] %vm4551_vm7, %v1537_v44 }
0x112a   : > { %v2503_v3 = vsel %vm1516_vm6, %v2502_v49, %v2485_v62  ;;  %v2506_v50 = vsel %vm1516_vm6, %v2505_v51, %v2499_v52 }
0x112b   : > { %3691 = shalt.err (!%p3688_p12)
}
0x112c   : > { %s3692_s19 = scalar_lea.hbm %s4560_s22, 32  ;;  %s3696_s10 = scalar_lea.hbm %s4758_s14, 64 }
0x112d   : > { %p3693_p10 = scmp.ne.s32.totalorder %s4560_s22, %s3692_s19  ;;  %p3697_p5 = scmp.lt.s32.totalorder %s4560_s22, %s4758_s14 }
0x112e   : > { %p3698_p3 = scmp.lt.s32.totalorder %s3696_s10, %s3692_s19 }
0x112f   : > { %p3694_p13 = pnand %p3693_p10, %p4759_p4 }
0x1130   : > { %p3699_p7 = por %p3698_p3, %p3697_p5 }
0x1131   : > { %p3695_p9 = pneg %p3694_p13 }
0x1133   : > { %p3700_p2 = pnand %p3699_p7, %p3695_p9 }
0x1135   : > { %3703 = shalt.err (!%p3700_p2)
}
0x1136   : > { %3355 = dma.vmem_to_hbm [thread:$0]  (%p4759_p4), %s4562_s21, 32, %s4560_s22, %s2756_s7   ;;  %v2509_v53 = vcombine.low %v2503_v3, %v2506_v50  ;;  %v2701_v54 = vpop.permute.xlu1 %2700  ;;  %v2715_v55 = vpop.permute.xlu0 %2714  ;;  %v2711_v60 = vrot.slane %v4514_v11, 4 }
0x1137   : > { %s624_s29 = scalar_lea.vmem [#allocation17], %s4537_s25  ;;  %s4760_s0 = sld [smem:[#allocation37_spill]] }
0x1138   : > { %s2803_s30 = sshll.u32 %s624_s29, 4  ;;  %v2516_v56 = vrot.slane %v2509_v53, %v4541_v5  ;;  %s3838_s22 = smov [#allocation17]   ;;  %s4605_s30 = int_to_ptr.vmem [resolvable:$true] %s2803_s30 }
0x1139   : > { %s3704_s21 = scalar_lea.vmem %s4605_s30, 32  ;;  %s3708_s12 = sshll.u32 %s3838_s22, 4  ;;  %s3709_s12 = int_to_ptr.vmem [resolvable:$false] %s3708_s12 }
0x113a   : > { %v2523_v57 = vrot.slane %v2516_v56, %v4541_v5  ;;  %v2705_v58 = vpop.permute.xlu1 %2704  ;;  %v2719_v59 = vpop.permute.xlu0 %2718  ;;  %p3705_p8 = scmp.ne.s32.totalorder %s4605_s30, %s3704_s21  ;;  %s3710_s24 = scalar_lea.vmem %s3709_s12, 64 }
0x113b   : > { %p3711_p1 = scmp.lt.s32.totalorder %s4605_s30, %s3709_s12  ;;  %p3712_p6 = scmp.lt.s32.totalorder %s3710_s24, %s3704_s21 }
0x113c   : > { %2525 = vst.msk [vmem:[%s624_s29] sm:$0x3] %vm4551_vm7, %v2523_v57  ;;  %p3706_p11 = pnand %p3705_p8, %p4759_p4 }
0x113d   : > { %s4603_s19 = scalar_lea.hbm %s4760_s0, %s4546_s15  ;;  %p3713_p12 = por %p3712_p6, %p3711_p1 }
0x113e   : > { %p3707_p0 = pneg %p3706_p11 }
0x1140   : > { %p3714_p10 = pnand %p3713_p12, %p3707_p0 }
0x1142   : > { %3717 = shalt.err (!%p3714_p10)
}
0x1143   : > { %s3718_s10 = scalar_lea.hbm %s4603_s19, 32  ;;  %s3722_s29 = scalar_lea.hbm %s4760_s0, 64 }
0x1144   : > { %p3719_p13 = scmp.ne.s32.totalorder %s4603_s19, %s3718_s10  ;;  %p3723_p3 = scmp.lt.s32.totalorder %s4603_s19, %s4760_s0 }
0x1145   : > { %p3724_p7 = scmp.lt.s32.totalorder %s3722_s29, %s3718_s10 }
0x1146   : > { %p3720_p9 = pnand %p3719_p13, %p4759_p4 }
0x1147   : > { %p3725_p2 = por %p3724_p7, %p3723_p3 }
0x1148   : > { %p3721_p5 = pneg %p3720_p9 }
0x114a   : > { %p3726_p8 = pnand %p3725_p2, %p3721_p5 }
0x114c   : > { %3729 = shalt.err (!%p3726_p8)
}
0x114d   : > { %3356 = dma.vmem_to_hbm [thread:$0]  (%p4759_p4), %s4605_s30, 32, %s4603_s19, %s2756_s7   ;;  %v2725_v61 = vsel %vm631_vm1, %v4514_v11, %v2701_v54  ;;  %v2728_v63 = vsel %vm631_vm1, %v2711_v60, %v2715_v55  ;;  %v2709_v2 = vpop.permute.xlu1 %2708  ;;  %v2723_v6 = vpop.permute.xlu0 %2722 }
0x114e   : > { %v2726_v46 = vsel %vm1514_vm5, %v2725_v61, %v2705_v58  ;;  %v2729_v1 = vsel %vm1514_vm5, %v2728_v63, %v2719_v59  ;;  %s610_s16 = scalar_lea.vmem [#allocation14], %s4537_s25  ;;  %s4761_s21 = sld [smem:[#allocation35_spill]] }
0x114f   : > { %v2727_v7 = vsel %vm1516_vm6, %v2726_v46, %v2709_v2  ;;  %v2730_v37 = vsel %vm1516_vm6, %v2729_v1, %v2723_v6  ;;  %s2775_s7 = sshll.u32 %s610_s16, 4  ;;  %s2751_s12 = scalar_lea.sflag [#allocation4], %s4137_s11  ;;  %s2776_s7 = int_to_ptr.vmem [resolvable:$true] %s2775_s7 }
0x1150   : > { %v2733_v8 = vcombine.low %v2727_v7, %v2730_v37  ;;  %s3730_s24 = scalar_lea.vmem %s2776_s7, 32  ;;  %s3839_s25 = smov [#allocation14]  }
0x1151   : > { %p3731_p11 = scmp.ne.s32.totalorder %s2776_s7, %s3730_s24  ;;  %s3734_s10 = sshll.u32 %s3839_s25, 4  ;;  %s3735_s10 = int_to_ptr.vmem [resolvable:$false] %s3734_s10 }
0x1152   : > { %v2740_v9 = vrot.slane %v2733_v8, %v4541_v5  ;;  %s3736_s23 = scalar_lea.vmem %s3735_s10, 64  ;;  %p3737_p6 = scmp.lt.s32.totalorder %s2776_s7, %s3735_s10 }
0x1153   : > { %p3732_p0 = pnand %p3731_p11, %p4759_p4  ;;  %p3738_p12 = scmp.lt.s32.totalorder %s3736_s23, %s3730_s24 }
0x1154   : > { %v2747_v10 = vrot.slane %v2740_v9, %v4541_v5  ;;  %s2773_s22 = scalar_lea.hbm %s4761_s21, %s4546_s15 }
0x1155   : > { %p3733_p1 = pneg %p3732_p0  ;;  %p3739_p10 = por %p3738_p12, %p3737_p6 }
0x1156   : > { %2749 = vst.msk [vmem:[%s610_s16] sm:$0x3] %vm4551_vm7, %v2747_v10 }
0x1157   : > { %p3740_p13 = pnand %p3739_p10, %p3733_p1 }
0x1159   : > { %3743 = shalt.err (!%p3740_p13)
}
0x115a   : > { %s3744_s15 = scalar_lea.hbm %s2773_s22, 32  ;;  %s3748_s29 = scalar_lea.hbm %s4761_s21, 64 }
0x115b   : > { %p3745_p9 = scmp.ne.s32.totalorder %s2773_s22, %s3744_s15  ;;  %p3749_p7 = scmp.lt.s32.totalorder %s2773_s22, %s4761_s21 }
0x115c   : > { %p3750_p2 = scmp.lt.s32.totalorder %s3748_s29, %s3744_s15 }
0x115d   : > { %p3746_p5 = pnand %p3745_p9, %p4759_p4 }
0x115e   : > { %p3751_p8 = por %p3750_p2, %p3749_p7 }
0x115f   : > { %p3747_p3 = pneg %p3746_p5 }
0x1161   : > { %p3752_p11 = pnand %p3751_p8, %p3747_p3 }
0x1163   : > { %3755 = shalt.err (!%p3752_p11)
}
0x1164   : > { %3354 = dma.vmem_to_hbm [thread:$0]  (%p4759_p4), %s2776_s7, 32, %s2773_s22, %s2751_s12  }
0x1165 PF: > { %s4762_s16 = sld [smem:[#allocation25_spill]]  ;;  %p4765_p1 = scmp.ge.s32.totalorder %s3814_s28, 2 }
0x1166   : > { %s4763_s30 = sld [smem:[#allocation26_spill]] }
0x116b   : > { %s2815_s19 = sand.u32 1, %s4762_s16  }
0x116c   : > { %p4764_p0 = scmp.ne.s32.totalorder %s4763_s30, 0  ;;  %s2816_s24 = scalar_lea.sflag [#allocation4], %s2815_s19 }
0x116e   : > { %p3384_p6 = pnand %p4765_p1, %p4764_p0 }
0x1170   : > { %p3385_p12 = pneg %p3384_p6 }
0x1172   : > { %3793 = dma.done.wait (%p3385_p12), %s2816_s24, 32  }
0x1173   : > { %3795 = vsyncadd (%p3385_p12), %s2816_s24, 4294967264  ;;  %s4766_s25 = sadd.s32 4294967294, %s3814_s28  }
0x1174   : > { %s2824_s10 = sand.u32 1, %s4766_s25  }
0x1175   : > { %s2825_s23 = scalar_lea.sflag [#allocation16], %s2824_s10 }
0x1176   : > { %3797 = dma.done.wait (%p3385_p12), %s2825_s23, 64  }
0x1177   : > { %3799 = vsyncadd (%p3385_p12), %s2825_s23, 4294967232  ;;  %s4767_s28 = sld [smem:[#allocation27_spill]]  ;;  %s4769_s25 = smov %s3806_s26 }
0x1178   : > { %s4768_s17 = sld [smem:[#allocation29_spill]]  ;;  %s4770_s26 = smov %s3810_s27 }
0x117d   : > { %p37_p4 = scmp.ge.s32.totalorder %s4767_s28, 4  }
0x117e   : > { %s4771_s27 = smov %s4768_s17 }
0x117f   :  { %39 = sbr.rel (!%p37_p4) target bundleno = 21 (0x15), region = 190 }
0x1184   :  { %2839 = vsyncpa [#allocation3], 1 }
0x1185   :  { %2841 = vsyncpa [#allocation3 + $0x1], 1 }
0x1186   :  { %2842 = vsyncpa [#allocation6], 1 }
0x1187   :  { %2844 = vsyncpa [#allocation6 + $0x1], 1 }
0x1188   :  { %2845 = vsyncpa [#allocation9], 1 }
0x1189   :  { %2847 = vsyncpa [#allocation9 + $0x1], 1 }
0x118a   :  { %2848 = vsyncpa [#allocation12], 1 }
0x118b   :  { %2849 = vsyncpa [#allocation4], 1 }
0x118c   :  { %2851 = vsyncpa [#allocation4 + $0x1], 1 }
0x118d   :  { %2852 = vsyncpa [#allocation16], 1 }
0x118e   :  { %2854 = vsyncpa [#allocation16 + $0x1], 1 }

</bundles_post_ra>
